<compile_context>
chip_gen: v5e
topology: v5e:2x2
jax: 0.10.0
libtpu: 0.0.40
codegen_flags: <defaults>
</compile_context>

<pallas_src>
import jax
import jax.numpy as jnp
from jax.experimental import pallas as pl
from jax.experimental.pallas import tpu as pltpu

D_IN = 28 * 28       # 784
H1 = 512
H2 = 128
N_OUT = 10
N_OUT_PAD = 128      # lane-dense output width
MAX_TB = 1024        # keeps double-buffered x tile + f32 h1 well under v5e's 16 MiB scoped VMEM


def _round_up(x, m):
    return (x + m - 1) // m * m


def _cdiv(a, b):
    return -(-a // b)


def _choose_tile(B):
    """Pick (TB, Bp): batch tile and padded batch. TB multiple of 16, Bp = grid*TB."""
    b16 = _round_up(max(B, 1), 16)          # bf16 native tile is (16, 128)
    if b16 <= 64:
        return b16, b16                     # tiny batch: single tile, pure latency path
    # >= 2 grid steps (even count) so ("parallel",) shards across v7x's 2 TensorCores;
    # TB capped at MAX_TB for v5e scoped-VMEM safety; pad waste < 16 rows per tile.
    n = max(2, _cdiv(b16, MAX_TB))
    if n % 2:
        n += 1
    tb = _round_up(_cdiv(b16, n), 16)
    return tb, n * tb


def mlp_kernel(x_ref, w1_ref, b1_ref, w2_ref, b2_ref, w3_ref, b3_ref, o_ref):
    # fc1 + ReLU  (bf16 MXU, f32 accumulate, f32 elementwise)
    h1 = jnp.dot(x_ref[...], w1_ref[...], preferred_element_type=jnp.float32)
    h1 = jnp.maximum(h1 + b1_ref[...], 0.0)
    # fc2 + ReLU
    h2 = jnp.dot(h1.astype(jnp.bfloat16), w2_ref[...],
                 preferred_element_type=jnp.float32)
    h2 = jnp.maximum(h2 + b2_ref[...], 0.0)
    # fc3 (output padded to 128 columns -> unmasked lane-dense store)
    out = jnp.dot(h2.astype(jnp.bfloat16), w3_ref[...],
                  preferred_element_type=jnp.float32)
    o_ref[...] = (out + b3_ref[...]).astype(o_ref.dtype)


def prepare_params(params):
    """One-time conversion of (in, out)-layout f32 params to kernel layout.

    Hoisted out of the per-call path: bf16 weight casts and the fc3 zero-pad to a
    lane-dense 128-wide output happen exactly once.
    """
    w1, b1, w2, b2, w3, b3 = params
    w1p = w1.astype(jnp.bfloat16)                                            # (784, 512)
    w2p = w2.astype(jnp.bfloat16)                                            # (512, 128)
    w3p = jnp.zeros((H2, N_OUT_PAD), jnp.bfloat16).at[:, :N_OUT].set(
        w3.astype(jnp.bfloat16))                                             # (128, 128)
    b1p = b1.reshape(1, H1).astype(jnp.float32)
    b2p = b2.reshape(1, H2).astype(jnp.float32)
    b3p = jnp.zeros((1, N_OUT_PAD), jnp.float32).at[:, :N_OUT].set(
        b3.reshape(1, N_OUT).astype(jnp.float32))
    return (w1p, b1p, w2p, b2p, w3p, b3p)


def _net_forward(x, prepared):
    """x: (B, 1, 28, 28) or (B, 784) float32. Returns (B, 10) float32 logits."""
    w1p, b1p, w2p, b2p, w3p, b3p = prepared
    x2d = x.reshape(-1, D_IN)
    B = x2d.shape[0]

    TB, Bp = _choose_tile(B)
    xp = x2d.astype(jnp.bfloat16)
    if Bp != B:
        xp = jnp.pad(xp, ((0, Bp - B), (0, 0)))

    grid = (Bp // TB,)
    const = lambda i: (0, 0)   # same block every step -> stays VMEM resident

    bytes_accessed = (
        xp.size * 2
        + sum(int(p.size) * p.dtype.itemsize for p in prepared)
        + Bp * N_OUT_PAD * 4
    )
    cost = pl.CostEstimate(
        flops=2 * Bp * (D_IN * H1 + H1 * H2 + H2 * N_OUT_PAD),
        bytes_accessed=bytes_accessed,
        transcendentals=0,
    )

    out_padded = pl.pallas_call(
        mlp_kernel,
        out_shape=jax.ShapeDtypeStruct((Bp, N_OUT_PAD), jnp.float32),
        grid=grid,
        in_specs=[
            pl.BlockSpec((TB, D_IN), lambda i: (i, 0)),   # x tile streamed; 784 = full dim
            pl.BlockSpec((D_IN, H1), const),              # w1 (bf16)
            pl.BlockSpec((1, H1), const),                 # b1 (f32)
            pl.BlockSpec((H1, H2), const),                # w2
            pl.BlockSpec((1, H2), const),                 # b2
            pl.BlockSpec((H2, N_OUT_PAD), const),         # w3 (padded out cols)
            pl.BlockSpec((1, N_OUT_PAD), const),          # b3 (padded out cols)
        ],
        out_specs=pl.BlockSpec((TB, N_OUT_PAD), lambda i: (i, 0)),
        compiler_params=pltpu.CompilerParams(
            dimension_semantics=("parallel",),
        ),
        cost_estimate=cost,
    )(xp, w1p, b1p, w2p, b2p, w3p, b3p)

    return out_padded[:B, :N_OUT]


net_forward = jax.jit(_net_forward)


def init_params(key):
    """Deterministic synthetic parameters matching the PyTorch module shapes.

    PyTorch stores weights as (out, in) with weight = randn_like; we keep the
    transpose (in, out) so the kernel computes x @ W_torch.T exactly.
    """
    k1, k2, k3, kb1, kb2, kb3 = jax.random.split(key, 6)
    w1_t = jax.random.normal(k1, (H1, D_IN), dtype=jnp.float32)   # fc1.weight
    w2_t = jax.random.normal(k2, (H2, H1), dtype=jnp.float32)     # fc2.weight
    w3_t = jax.random.normal(k3, (N_OUT, H2), dtype=jnp.float32)  # fc3.weight
    b1 = jax.random.normal(kb1, (1, H1), dtype=jnp.float32) * 0.01
    b2 = jax.random.normal(kb2, (1, H2), dtype=jnp.float32) * 0.01
    b3 = jax.random.normal(kb3, (1, N_OUT), dtype=jnp.float32) * 0.01
    return (w1_t.T, b1, w2_t.T, b2, w3_t.T, b3)


def reference_forward(x, params, compute_dtype=jnp.float32):
    """Pure-JAX reference matching PyTorch forward semantics.

    With compute_dtype=bfloat16 it mirrors the kernel's bf16-inputs / f32-accum
    numerics (same MXU path), which is what we assert against.
    """
    w1, b1, w2, b2, w3, b3 = params
    h = x.reshape(-1, D_IN).astype(compute_dtype)
    h = jnp.dot(h, w1.astype(compute_dtype), preferred_element_type=jnp.float32) + b1
    h = jnp.maximum(h, 0.0)
    h = jnp.dot(h.astype(compute_dtype), w2.astype(compute_dtype),
                preferred_element_type=jnp.float32) + b2
    h = jnp.maximum(h, 0.0)
    return jnp.dot(h.astype(compute_dtype), w3.astype(compute_dtype),
                   preferred_element_type=jnp.float32) + b3


if __name__ == "__main__":
    key = jax.random.PRNGKey(0)
    kx, kp = jax.random.split(key)
    params = init_params(kp)
    prepared = jax.block_until_ready(prepare_params(params))   # one-time param prep

    # Small-batch (single-tile) and mid-batch (2-step grid) paths.
    for B in (8, 200):
        x = jax.random.normal(jax.random.fold_in(kx, B), (B, 1, 28, 28),
                              dtype=jnp.float32)
        out = jax.block_until_ready(net_forward(x, prepared))
        ref_bf16 = reference_forward(x, params, compute_dtype=jnp.bfloat16)
        assert out.shape == (B, N_OUT), out.shape
        assert jnp.allclose(out, ref_bf16, rtol=1e-2, atol=0.5), \
            float(jnp.max(jnp.abs(out - ref_bf16)))
    print("KERNEL_OK")
</pallas_src>

<mosaic_0001>
module attributes {stable_mosaic.version = 11 : i64} {
  func.func @mlp_kernel(%arg0: i32, %arg1: memref<16x784xbf16, #tpu.memory_space<vmem>>, %arg2: memref<784x512xbf16, #tpu.memory_space<vmem>>, %arg3: memref<1x512xf32, #tpu.memory_space<vmem>>, %arg4: memref<512x128xbf16, #tpu.memory_space<vmem>>, %arg5: memref<1x128xf32, #tpu.memory_space<vmem>>, %arg6: memref<128x128xbf16, #tpu.memory_space<vmem>>, %arg7: memref<1x128xf32, #tpu.memory_space<vmem>>, %arg8: memref<16x128xf32, #tpu.memory_space<vmem>>) attributes {dimension_semantics = [#tpu.dimension_semantics<parallel>], iteration_bounds = array<i64: 1>, scalar_prefetch = 0 : i64, scratch_operands = 0 : i64, tpu.core_type = #tpu.core_type<tc>, window_params = [{transform_indices = @transform_0, window_bounds = array<i64: 16, 784>}, {pipeline_mode = #tpu.pipeline_mode<synchronous>, transform_indices = @transform_1, window_bounds = array<i64: 784, 512>}, {pipeline_mode = #tpu.pipeline_mode<synchronous>, transform_indices = @transform_2, window_bounds = array<i64: 1, 512>}, {pipeline_mode = #tpu.pipeline_mode<synchronous>, transform_indices = @transform_3, window_bounds = array<i64: 512, 128>}, {pipeline_mode = #tpu.pipeline_mode<synchronous>, transform_indices = @transform_4, window_bounds = array<i64: 1, 128>}, {pipeline_mode = #tpu.pipeline_mode<synchronous>, transform_indices = @transform_5, window_bounds = array<i64: 128, 128>}, {pipeline_mode = #tpu.pipeline_mode<synchronous>, transform_indices = @transform_6, window_bounds = array<i64: 1, 128>}, {transform_indices = @transform_7, window_bounds = array<i64: 16, 128>}]} {
    %c0 = arith.constant 0 : index
    %c0_0 = arith.constant 0 : index
    %0 = vector.load %arg1[%c0, %c0_0] : memref<16x784xbf16, #tpu.memory_space<vmem>>, vector<16x784xbf16>
    %c0_1 = arith.constant 0 : index
    %c0_2 = arith.constant 0 : index
    %1 = vector.load %arg2[%c0_1, %c0_2] : memref<784x512xbf16, #tpu.memory_space<vmem>>, vector<784x512xbf16>
    %cst = arith.constant dense<0.000000e+00> : vector<16x512xf32>
    %2 = tpu.matmul %0, %1, %cst {dimension_numbers = #tpu.dot_dimension_numbers<[1], [0], [0], [1], [0, 0, 1, 1], [], []>} : vector<16x784xbf16>, vector<784x512xbf16>, vector<16x512xf32> -> vector<16x512xf32>
    %c0_3 = arith.constant 0 : index
    %c0_4 = arith.constant 0 : index
    %3 = vector.load %arg3[%c0_3, %c0_4] : memref<1x512xf32, #tpu.memory_space<vmem>>, vector<1x512xf32>
    %4 = vector.broadcast %3 : vector<1x512xf32> to vector<16x512xf32>
    %5 = arith.addf %2, %4 : vector<16x512xf32>
    %cst_5 = arith.constant 0.000000e+00 : f32
    %6 = vector.broadcast %cst_5 : f32 to vector<16x512xf32>
    %7 = arith.maximumf %5, %6 : vector<16x512xf32>
    %8 = arith.truncf %7 : vector<16x512xf32> to vector<16x512xbf16>
    %c0_6 = arith.constant 0 : index
    %c0_7 = arith.constant 0 : index
    %9 = vector.load %arg4[%c0_6, %c0_7] : memref<512x128xbf16, #tpu.memory_space<vmem>>, vector<512x128xbf16>
    %cst_8 = arith.constant dense<0.000000e+00> : vector<16x128xf32>
    %10 = tpu.matmul %8, %9, %cst_8 {dimension_numbers = #tpu.dot_dimension_numbers<[1], [0], [0], [1], [0, 0, 1, 1], [], []>} : vector<16x512xbf16>, vector<512x128xbf16>, vector<16x128xf32> -> vector<16x128xf32>
    %c0_9 = arith.constant 0 : index
    %c0_10 = arith.constant 0 : index
    %11 = vector.load %arg5[%c0_9, %c0_10] : memref<1x128xf32, #tpu.memory_space<vmem>>, vector<1x128xf32>
    %12 = vector.broadcast %11 : vector<1x128xf32> to vector<16x128xf32>
    %13 = arith.addf %10, %12 : vector<16x128xf32>
    %cst_11 = arith.constant 0.000000e+00 : f32
    %14 = vector.broadcast %cst_11 : f32 to vector<16x128xf32>
    %15 = arith.maximumf %13, %14 : vector<16x128xf32>
    %16 = arith.truncf %15 : vector<16x128xf32> to vector<16x128xbf16>
    %c0_12 = arith.constant 0 : index
    %c0_13 = arith.constant 0 : index
    %17 = vector.load %arg6[%c0_12, %c0_13] : memref<128x128xbf16, #tpu.memory_space<vmem>>, vector<128x128xbf16>
    %cst_14 = arith.constant dense<0.000000e+00> : vector<16x128xf32>
    %18 = tpu.matmul %16, %17, %cst_14 {dimension_numbers = #tpu.dot_dimension_numbers<[1], [0], [0], [1], [0, 0, 1, 1], [], []>} : vector<16x128xbf16>, vector<128x128xbf16>, vector<16x128xf32> -> vector<16x128xf32>
    %c0_15 = arith.constant 0 : index
    %c0_16 = arith.constant 0 : index
    %19 = vector.load %arg7[%c0_15, %c0_16] : memref<1x128xf32, #tpu.memory_space<vmem>>, vector<1x128xf32>
    %20 = vector.broadcast %19 : vector<1x128xf32> to vector<16x128xf32>
    %21 = arith.addf %18, %20 : vector<16x128xf32>
    %c0_17 = arith.constant 0 : index
    %c0_18 = arith.constant 0 : index
    %22 = vector.load %arg8[%c0_17, %c0_18] : memref<16x128xf32, #tpu.memory_space<vmem>>, vector<16x128xf32>
    tpu.vector_store %arg8[%c0_17, %c0_18], %21 {strides = array<i32>} : memref<16x128xf32, #tpu.memory_space<vmem>>, vector<16x128xf32>,
    return
  }
  func.func @transform_0(%arg0: i32) -> (i32, i32) {
    %c0_i32 = arith.constant 0 : i32
    %c0_i32_0 = arith.constant 0 : i32
    return %arg0, %c0_i32 : i32, i32
  }
  func.func @transform_1(%arg0: i32) -> (i32, i32) {
    %c0_i32 = arith.constant 0 : i32
    %c0_i32_0 = arith.constant 0 : i32
    %c0_i32_1 = arith.constant 0 : i32
    return %c0_i32, %c0_i32_0 : i32, i32
  }
  func.func @transform_2(%arg0: i32) -> (i32, i32) {
    %c0_i32 = arith.constant 0 : i32
    %c0_i32_0 = arith.constant 0 : i32
    %c0_i32_1 = arith.constant 0 : i32
    return %c0_i32, %c0_i32_0 : i32, i32
  }
  func.func @transform_3(%arg0: i32) -> (i32, i32) {
    %c0_i32 = arith.constant 0 : i32
    %c0_i32_0 = arith.constant 0 : i32
    %c0_i32_1 = arith.constant 0 : i32
    return %c0_i32, %c0_i32_0 : i32, i32
  }
  func.func @transform_4(%arg0: i32) -> (i32, i32) {
    %c0_i32 = arith.constant 0 : i32
    %c0_i32_0 = arith.constant 0 : i32
    %c0_i32_1 = arith.constant 0 : i32
    return %c0_i32, %c0_i32_0 : i32, i32
  }
  func.func @transform_5(%arg0: i32) -> (i32, i32) {
    %c0_i32 = arith.constant 0 : i32
    %c0_i32_0 = arith.constant 0 : i32
    %c0_i32_1 = arith.constant 0 : i32
    return %c0_i32, %c0_i32_0 : i32, i32
  }
  func.func @transform_6(%arg0: i32) -> (i32, i32) {
    %c0_i32 = arith.constant 0 : i32
    %c0_i32_0 = arith.constant 0 : i32
    %c0_i32_1 = arith.constant 0 : i32
    return %c0_i32, %c0_i32_0 : i32, i32
  }
  func.func @transform_7(%arg0: i32) -> (i32, i32) {
    %c0_i32 = arith.constant 0 : i32
    %c0_i32_0 = arith.constant 0 : i32
    return %arg0, %c0_i32 : i32, i32
  }
}

</mosaic_0001>

<bundles_post_ra>
// kernel: _net_forward.1
= control target key start
LH: loop header
LB: loop body
LE: loop exit
PB: predicated region body
PF: predicated region fallthrough
CT: control target
= control target key end

     0   :  { %12 = vsyncpa [#allocation3], 0  ;;  %s3338_s27 = smov [#allocation2]   ;;  %s3339_s29 = smov 256   ;;  %s3613_s0 = inlined_call_operand.vmem [shape: bf16[16,784], index: 0, kind: input, shape index: {}]   ;;  %s3614_s1 = inlined_call_operand.hbm [shape: bf16[784,512], index: 1, kind: input, shape index: {}]   ;;  %s3615_s2 = inlined_call_operand.vmem [shape: f32[1,512], index: 2, kind: input, shape index: {}]   ;;  %s3616_s3 = inlined_call_operand.vmem [shape: bf16[512,128], index: 3, kind: input, shape index: {}]   ;;  %s3617_s4 = inlined_call_operand.vmem [shape: f32[1,128], index: 4, kind: input, shape index: {}]   ;;  %s3618_s5 = inlined_call_operand.vmem [shape: bf16[128,128], index: 5, kind: input, shape index: {}]   ;;  %s3619_s6 = inlined_call_operand.vmem [shape: f32[1,128], index: 6, kind: input, shape index: {}]   ;;  %s3620_s7 = inlined_call_operand.vmem [shape: f32[16,128], index: 7, kind: output, shape index: {}]  }
   0x1   :  { %s19_s26 = sshll.u32 %s3614_s1, 4  ;;  %s21_s28 = sshll.u32 %s3338_s27, 4  ;;  %s20_s26 = int_to_ptr.hbm [resolvable:$true] %s19_s26  ;;  %s22_s28 = int_to_ptr.vmem [resolvable:$true] %s21_s28 }
   0x2   :  { %s3340_s30 = smov 16  }
   0x3   :  { %27 = dma.hbm_to_vmem [thread:$0]  %s20_s26, 25088, %s22_s28, [#allocation3], %s3339_s29, %s3339_s29, %s3340_s30  }
   0x4   :  { %3336 = dma.done.wait [#allocation3], 25088  }
   0x5   :  { %3337 = vsyncadd [#allocation3], 4294942208  ;;  %v2230_v0 = vld [vmem:[#allocation2 + $0xe0] sm:$0xf]  ;;  %v3101_v1 = vld [vmem:[#allocation2 + $0xec] sm:$0xf0] }
   0x6   :  { %v2358_v2 = vld [vmem:[#allocation2 + $0x1e0] sm:$0xf]  ;;  %v2231_v3 = vor.u32 %v3101_v1, %v2230_v0  ;;  %v3133_v4 = vld [vmem:[#allocation2 + $0x1ec] sm:$0xf0]  ;;  %vm1272_vm0 = vcmask 130048  }
   0x7   :  { %v2486_v5 = vld [vmem:[#allocation2 + $0x2e0] sm:$0xf]  ;;  %v3165_v6 = vld [vmem:[#allocation2 + $0x2ec] sm:$0xf0]  ;;  %v2359_v7 = vor.u32 %v3133_v4, %v2358_v2 }
   0x8   :  { %v2487_v8 = vor.u32 %v3165_v6, %v2486_v5  ;;  %v2614_v9 = vld [vmem:[#allocation2 + $0x3e0] sm:$0xf]  ;;  %v3197_v10 = vld [vmem:[#allocation2 + $0x3ec] sm:$0xf0]  ;;  %1276 = vmatpush.bf16.msra.mxu0 %v2231_v3 }
   0x9   :  { %v2214_v11 = vld [vmem:[#allocation2 + $0xc0] sm:$0xf]  ;;  %v2615_v12 = vor.u32 %v3197_v10, %v2614_v9  ;;  %v3097_v13 = vld [vmem:[#allocation2 + $0xcc] sm:$0xf0]  ;;  %1290 = vmatpush.bf16.msra.mxu1 %v2359_v7 }
   0xa   :  { %v2342_v14 = vld [vmem:[#allocation2 + $0x1c0] sm:$0xf]  ;;  %v3129_v15 = vld [vmem:[#allocation2 + $0x1cc] sm:$0xf0]  ;;  %1304 = vmatpush.bf16.msra.mxu2 %v2487_v8  ;;  %v2215_v16 = vor.u32 %v3097_v13, %v2214_v11 }
   0xb   :  { %v2343_v17 = vor.u32 %v3129_v15, %v2342_v14  ;;  %v2470_v18 = vld [vmem:[#allocation2 + $0x2c0] sm:$0xf]  ;;  %v3161_v19 = vld [vmem:[#allocation2 + $0x2cc] sm:$0xf0]  ;;  %1318 = vmatpush.bf16.msra.mxu3 %v2615_v12 }
   0xc   :  { %v2598_v20 = vld [vmem:[#allocation2 + $0x3c0] sm:$0xf]  ;;  %v2471_v21 = vor.u32 %v3161_v19, %v2470_v18  ;;  %v3193_v22 = vld [vmem:[#allocation2 + $0x3cc] sm:$0xf0]  ;;  %1277 = vmatpush.bf16.msra.mxu0 %v2215_v16 }
   0xd   :  { %v2198_v23 = vld [vmem:[#allocation2 + $0xa0] sm:$0xf]  ;;  %v3093_v24 = vld [vmem:[#allocation2 + $0xac] sm:$0xf0]  ;;  %v2599_v25 = vor.u32 %v3193_v22, %v2598_v20  ;;  %1291 = vmatpush.bf16.msra.mxu1 %v2343_v17 }
   0xe   :  { %v2326_v26 = vld [vmem:[#allocation2 + $0x1a0] sm:$0xf]  ;;  %v3125_v27 = vld [vmem:[#allocation2 + $0x1ac] sm:$0xf0]  ;;  %v2199_v29 = vor.u32 %v3093_v24, %v2198_v23  ;;  %1305 = vmatpush.bf16.msra.mxu2 %v2471_v21 }
   0xf   :  { %v2454_v28 = vld [vmem:[#allocation2 + $0x2a0] sm:$0xf]  ;;  %v3157_v30 = vld [vmem:[#allocation2 + $0x2ac] sm:$0xf0]  ;;  %v2327_v33 = vor.u32 %v3125_v27, %v2326_v26  ;;  %1319 = vmatpush.bf16.msra.mxu3 %v2599_v25 }
  0x10   :  { %v2582_v31 = vld [vmem:[#allocation2 + $0x3a0] sm:$0xf]  ;;  %v3189_v32 = vld [vmem:[#allocation2 + $0x3ac] sm:$0xf0]  ;;  %v2455_v34 = vor.u32 %v3157_v30, %v2454_v28  ;;  %1278 = vmatpush.bf16.msra.mxu0 %v2199_v29 }
  0x11   :  { %v2182_v35 = vld [vmem:[#allocation2 + $0x80] sm:$0xf]  ;;  %v3089_v36 = vld [vmem:[#allocation2 + $0x8c] sm:$0xf0]  ;;  %v2583_v38 = vor.u32 %v3189_v32, %v2582_v31  ;;  %1292 = vmatpush.bf16.msra.mxu1 %v2327_v33  ;;  %v3099_v32 = vld [vmem:[#allocation2 + $0xe4] sm:$0xf] }
  0x12   :  { %v2310_v37 = vld [vmem:[#allocation2 + $0x180] sm:$0xf]  ;;  %v3121_v39 = vld [vmem:[#allocation2 + $0x18c] sm:$0xf0]  ;;  %v2183_v44 = vor.u32 %v3089_v36, %v2182_v35  ;;  %1306 = vmatpush.bf16.msra.mxu2 %v2455_v34  ;;  %v2232_v33 = vld [vmem:[#allocation2 + $0xf0] sm:$0xf0] }
  0x13   :  { %v2438_v40 = vld [vmem:[#allocation2 + $0x280] sm:$0xf]  ;;  %v3153_v41 = vld [vmem:[#allocation2 + $0x28c] sm:$0xf0]  ;;  %v2311_v45 = vor.u32 %v3121_v39, %v2310_v37  ;;  %1320 = vmatpush.bf16.msra.mxu3 %v2583_v38  ;;  %v2098_v34 = vld [vmem:[%s3613_s0 + $0x8] sm:$0xf] }
  0x14   :  { %v2566_v42 = vld [vmem:[#allocation2 + $0x380] sm:$0xf]  ;;  %v3185_v43 = vld [vmem:[#allocation2 + $0x38c] sm:$0xf0]  ;;  %v2439_v46 = vor.u32 %v3153_v41, %v2438_v40  ;;  %1279 = vmatpush.bf16.msra.mxu0 %v2183_v44  ;;  %v3068_v36 = vld [vmem:[%s3613_s0 + $0x20] sm:$0xf0] }
  0x15   :  { %v2166_v47 = vld [vmem:[#allocation2 + $0x60] sm:$0xf]  ;;  %v3085_v48 = vld [vmem:[#allocation2 + $0x6c] sm:$0xf0]  ;;  %v2567_v50 = vor.u32 %v3185_v43, %v2566_v42  ;;  %1293 = vmatpush.bf16.msra.mxu1 %v2311_v45  ;;  %v3131_v41 = vld [vmem:[#allocation2 + $0x1e4] sm:$0xf] }
  0x16   :  { %v2294_v49 = vld [vmem:[#allocation2 + $0x160] sm:$0xf]  ;;  %v3117_v51 = vld [vmem:[#allocation2 + $0x16c] sm:$0xf0]  ;;  %v2167_v56 = vor.u32 %v3085_v48, %v2166_v47  ;;  %1307 = vmatpush.bf16.msra.mxu2 %v2439_v46  ;;  %v3067_v43 = vld [vmem:[%s3613_s0 + $0x18] sm:$0xf0] }
  0x17   :  { %v2422_v52 = vld [vmem:[#allocation2 + $0x260] sm:$0xf]  ;;  %v3149_v53 = vld [vmem:[#allocation2 + $0x26c] sm:$0xf0]  ;;  %v2295_v57 = vor.u32 %v3117_v51, %v2294_v49  ;;  %1321 = vmatpush.bf16.msra.mxu3 %v2567_v50  ;;  %v2360_v46 = vld [vmem:[#allocation2 + $0x1f0] sm:$0xf0]  ;;  %v2235_v50 = vor.u32 %v3099_v32, %v2232_v33 }
  0x18   :  { %v2550_v54 = vld [vmem:[#allocation2 + $0x360] sm:$0xf]  ;;  %v3181_v55 = vld [vmem:[#allocation2 + $0x36c] sm:$0xf0]  ;;  %v2423_v58 = vor.u32 %v3149_v53, %v2422_v52  ;;  %1280 = vmatpush.bf16.msra.mxu0 %v2167_v56  ;;  %v3065_v47 = vld [vmem:[%s3613_s0 + $0xc] sm:$0xf] }
  0x19   :  { %v2150_v59 = vld [vmem:[#allocation2 + $0x40] sm:$0xf]  ;;  %v3081_v60 = vld [vmem:[#allocation2 + $0x4c] sm:$0xf0]  ;;  %v2551_v62 = vor.u32 %v3181_v55, %v2550_v54  ;;  %1294 = vmatpush.bf16.msra.mxu1 %v2295_v57  ;;  %v2100_v48 = vld [vmem:[%s3613_s0 + $0x24] sm:$0xf0]  ;;  %v3402_v54 = vor.u32 %v3068_v36, %v2098_v34 }
  0x1a   :  { %v2278_v61 = vld [vmem:[#allocation2 + $0x140] sm:$0xf]  ;;  %v3113_v63 = vld [vmem:[#allocation2 + $0x14c] sm:$0xf0]  ;;  %v2151_v4 = vor.u32 %v3081_v60, %v2150_v59  ;;  %1308 = vmatpush.bf16.msra.mxu2 %v2423_v58  ;;  %v3095_v57 = vld [vmem:[#allocation2 + $0xc4] sm:$0xf]  ;;  %v3406_v60 = vor.u32 %v3065_v47, %v2100_v48 }
  0x1b   :  { %v2406_v0 = vld [vmem:[#allocation2 + $0x240] sm:$0xf]  ;;  %v3145_v1 = vld [vmem:[#allocation2 + $0x24c] sm:$0xf0]  ;;  %v2279_v6 = vor.u32 %v3113_v63, %v2278_v61  ;;  %1322 = vmatpush.bf16.msra.mxu3 %v2551_v62  ;;  %v2216_v58 = vld [vmem:[#allocation2 + $0xd0] sm:$0xf0]  ;;  %v2363_v63 = vor.u32 %v3131_v41, %v2360_v46 }
  0x1c   :  { %v2534_v2 = vld [vmem:[#allocation2 + $0x340] sm:$0xf]  ;;  %v3177_v3 = vld [vmem:[#allocation2 + $0x34c] sm:$0xf0]  ;;  %v2407_v7 = vor.u32 %v3145_v1, %v2406_v0  ;;  %1281 = vmatpush.bf16.msra.mxu0 %v2151_v4  ;;  %v3064_v61 = vld [vmem:[%s3613_s0 + $0x4] sm:$0xf]  ;;  %v2219_v4 = vor.u32 %v3095_v57, %v2216_v58 }
  0x1d   :  { %v2134_v5 = vld [vmem:[#allocation2 + $0x20] sm:$0xf]  ;;  %v3077_v8 = vld [vmem:[#allocation2 + $0x2c] sm:$0xf0]  ;;  %v2535_v11 = vor.u32 %v3177_v3, %v2534_v2  ;;  %1295 = vmatpush.bf16.msra.mxu1 %v2279_v6  ;;  %v3127_v1 = vld [vmem:[#allocation2 + $0x1c4] sm:$0xf] }
  0x1e   :  { %v2262_v9 = vld [vmem:[#allocation2 + $0x120] sm:$0xf]  ;;  %v3109_v10 = vld [vmem:[#allocation2 + $0x12c] sm:$0xf0]  ;;  %v2135_v18 = vor.u32 %v3077_v8, %v2134_v5  ;;  %1309 = vmatpush.bf16.msra.mxu2 %v2407_v7  ;;  %v2344_v2 = vld [vmem:[#allocation2 + $0x1d0] sm:$0xf0] }
  0x1f   :  { %v2390_v12 = vld [vmem:[#allocation2 + $0x220] sm:$0xf]  ;;  %v3141_v13 = vld [vmem:[#allocation2 + $0x22c] sm:$0xf0]  ;;  %v2263_v23 = vor.u32 %v3109_v10, %v2262_v9  ;;  %1323 = vmatpush.bf16.msra.mxu3 %v2535_v11  ;;  %v3091_v10 = vld [vmem:[#allocation2 + $0xa4] sm:$0xf] }
  0x20   :  { %v2518_v14 = vld [vmem:[#allocation2 + $0x320] sm:$0xf]  ;;  %v3173_v15 = vld [vmem:[#allocation2 + $0x32c] sm:$0xf0]  ;;  %v2391_v24 = vor.u32 %v3141_v13, %v2390_v12  ;;  %1282 = vmatpush.bf16.msra.mxu0 %v2135_v18  ;;  %v2200_v11 = vld [vmem:[#allocation2 + $0xb0] sm:$0xf0]  ;;  %v2347_v12 = vor.u32 %v3127_v1, %v2344_v2 }
  0x21   :  { %v2118_v16 = vld [vmem:[#allocation2] sm:$0xf]  ;;  %v3073_v17 = vld [vmem:[#allocation2 + $0xc] sm:$0xf0]  ;;  %v2519_v28 = vor.u32 %v3173_v15, %v2518_v14  ;;  %1296 = vmatpush.bf16.msra.mxu1 %v2263_v23  ;;  %v3123_v14 = vld [vmem:[#allocation2 + $0x1a4] sm:$0xf] }
  0x22   :  { %v2246_v19 = vld [vmem:[#allocation2 + $0x100] sm:$0xf]  ;;  %v3105_v20 = vld [vmem:[#allocation2 + $0x10c] sm:$0xf0]  ;;  %v2119_v35 = vor.u32 %v3073_v17, %v2118_v16  ;;  %1310 = vmatpush.bf16.msra.mxu2 %v2391_v24  ;;  %v2328_v15 = vld [vmem:[#allocation2 + $0x1b0] sm:$0xf0]  ;;  %v2203_v17 = vor.u32 %v3091_v10, %v2200_v11 }
  0x23   :  { %v2374_v21 = vld [vmem:[#allocation2 + $0x200] sm:$0xf]  ;;  %v3137_v22 = vld [vmem:[#allocation2 + $0x20c] sm:$0xf0]  ;;  %v2247_v39 = vor.u32 %v3105_v20, %v2246_v19  ;;  %1324 = vmatpush.bf16.msra.mxu3 %v2519_v28  ;;  %v2184_v23 = vld [vmem:[#allocation2 + $0x90] sm:$0xf0]  ;;  %v2331_v24 = vor.u32 %v3123_v14, %v2328_v15 }
  0x24   :  { %v2502_v25 = vld [vmem:[#allocation2 + $0x300] sm:$0xf]  ;;  %v3169_v26 = vld [vmem:[#allocation2 + $0x30c] sm:$0xf0]  ;;  %v2375_v40 = vor.u32 %v3137_v22, %v2374_v21  ;;  %1283 = vmatpush.bf16.msra.mxu0 %v2119_v35  ;;  %v3087_v22 = vld [vmem:[#allocation2 + $0x84] sm:$0xf] }
  0x25   :  { %v2742_v27 = vld [vmem:[#allocation2 + $0x4e0] sm:$0xf]  ;;  %v3229_v29 = vld [vmem:[#allocation2 + $0x4ec] sm:$0xf0]  ;;  %v2503_v44 = vor.u32 %v3169_v26, %v2502_v25  ;;  %1297 = vmatpush.bf16.msra.mxu1 %v2247_v39  ;;  %v3119_v26 = vld [vmem:[#allocation2 + $0x184] sm:$0xf] }
  0x26   :  { %v2870_v30 = vld [vmem:[#allocation2 + $0x5e0] sm:$0xf]  ;;  %v3261_v31 = vld [vmem:[#allocation2 + $0x5ec] sm:$0xf0]  ;;  %v2743_v45 = vor.u32 %v3229_v29, %v2742_v27  ;;  %1311 = vmatpush.bf16.msra.mxu2 %v2375_v40  ;;  %v2312_v27 = vld [vmem:[#allocation2 + $0x190] sm:$0xf0]  ;;  %v2187_v29 = vor.u32 %v3087_v22, %v2184_v23 }
  0x27   :  { %v2886_v37 = vld [vmem:[#allocation2 + $0x600] sm:$0xf]  ;;  %v3265_v38 = vld [vmem:[#allocation2 + $0x60c] sm:$0xf0]  ;;  %v2871_v49 = vor.u32 %v3261_v31, %v2870_v30  ;;  %1325 = vmatpush.bf16.msra.mxu3 %v2503_v44  ;;  %v3083_v34 = vld [vmem:[#allocation2 + $0x64] sm:$0xf] }
  0x28   :  { %v2090_v42 = vld [vmem:[%s3613_s0] sm:$0xf]  ;;  %v3225_v52 = vld [vmem:[#allocation2 + $0x4cc] sm:$0xf0]  ;;  %v2887_v59 = vor.u32 %v3265_v38, %v2886_v37  ;;  %1332 = vmatpush.bf16.msrb.mxu0 %v2743_v45  ;;  %v2168_v35 = vld [vmem:[#allocation2 + $0x70] sm:$0xf0]  ;;  %v2315_v38 = vor.u32 %v3119_v26, %v2312_v27 }
  0x29   :  { %v2726_v51 = vld [vmem:[#allocation2 + $0x4c0] sm:$0xf]  ;;  %v3404_v55 = vor.u32 %v3067_v43, %v2090_v42  ;;  %v3257_v56 = vld [vmem:[#allocation2 + $0x5cc] sm:$0xf0]  ;;  %1346 = vmatpush.bf16.msrb.mxu1 %v2871_v49  ;;  %1312 = vmatmul.bf16.vlgmr.msra.gmra.mxu2 %v3402_v54  ;;  %v2114_v36 = vld [vmem:[%s3613_s0 + $0x18] sm:$0xf]  ;;  %v2171_v43 = vor.u32 %v3083_v34, %v2168_v35 }
  0x2a   :  { %v2854_v53 = vld [vmem:[#allocation2 + $0x5c0] sm:$0xf]  ;;  %v2727_v0 = vor.u32 %v3225_v52, %v2726_v51  ;;  %v3221_v6 = vld [vmem:[#allocation2 + $0x4ac] sm:$0xf0]  ;;  %1367 = vmatpush.bf16.msrb.mxu2 %v2887_v59  ;;  %1326 = vmatmul.bf16.vlgmr.msra.gmra.mxu3 %v3406_v60  ;;  %v3070_v37 = vld [vmem:[%s3613_s0 + $0x30] sm:$0xf0] }
  0x2b   :  { %v2092_v62 = vld [vmem:[%s3613_s0 + $0x1c] sm:$0xf0]  ;;  %1374 = vmatpush.bf16.msrb.mxu3 %v2235_v50  ;;  %v2855_v3 = vor.u32 %v3257_v56, %v2854_v53  ;;  %1284 = vmatmul.bf16.vlgmr.msra.gmra.mxu0 %v3404_v55  ;;  %v3253_v9 = vld [vmem:[#allocation2 + $0x5ac] sm:$0xf0]  ;;  %v3115_v40 = vld [vmem:[#allocation2 + $0x164] sm:$0xf]  ;;  %v3426_v50 = vor.u32 %v3070_v37, %v2114_v36 }
  0x2c   :  { %v2710_v5 = vld [vmem:[#allocation2 + $0x4a0] sm:$0xf]  ;;  %v3416_v8 = vor.u32 %v3064_v61, %v2092_v62  ;;  %1333 = vmatpush.bf16.msrb.mxu0 %v2727_v0  ;;  %v3217_v19 = vld [vmem:[#allocation2 + $0x48c] sm:$0xf0]  ;;  %v2296_v41 = vld [vmem:[#allocation2 + $0x170] sm:$0xf0] }
  0x2d   :  { %v2838_v7 = vld [vmem:[#allocation2 + $0x5a0] sm:$0xf]  ;;  %v2711_v13 = vor.u32 %v3221_v6, %v2710_v5  ;;  %1347 = vmatpush.bf16.msrb.mxu1 %v2855_v3  ;;  %v3249_v21 = vld [vmem:[#allocation2 + $0x58c] sm:$0xf0]  ;;  %v3079_v48 = vld [vmem:[#allocation2 + $0x44] sm:$0xf]  ;;  %v2299_v51 = vor.u32 %v3115_v40, %v2296_v41 }
  0x2e   :  { %1388 = vmatpush.bf16.msra.mxu2 %v2363_v63  ;;  %v2839_v16 = vor.u32 %v3253_v9, %v2838_v7  ;;  %v2694_v18 = vld [vmem:[#allocation2 + $0x480] sm:$0xf]  ;;  %1298 = vmatmul.bf16.vlgmr.msra.gmra.mxu1 %v3416_v8  ;;  %v3213_v31 = vld [vmem:[#allocation2 + $0x46c] sm:$0xf0]  ;;  %v2152_v49 = vld [vmem:[#allocation2 + $0x50] sm:$0xf0] }
  0x2f   :  { %1375 = vmatpush.bf16.msrb.mxu3 %v2219_v4  ;;  %v2822_v20 = vld [vmem:[#allocation2 + $0x580] sm:$0xf]  ;;  %v2695_v25 = vor.u32 %v3217_v19, %v2694_v18  ;;  %v3245_v33 = vld [vmem:[#allocation2 + $0x56c] sm:$0xf0]  ;;  %v3111_v53 = vld [vmem:[#allocation2 + $0x144] sm:$0xf]  ;;  %v2155_v58 = vor.u32 %v3079_v48, %v2152_v49 }
  0x30   :  { %1334 = vmatpush.bf16.msrb.mxu0 %v2711_v13  ;;  %v2823_v28 = vor.u32 %v3249_v21, %v2822_v20  ;;  %v2678_v30 = vld [vmem:[#allocation2 + $0x460] sm:$0xf]  ;;  %v3209_v45 = vld [vmem:[#allocation2 + $0x44c] sm:$0xf0]  ;;  %v2280_v56 = vld [vmem:[#allocation2 + $0x150] sm:$0xf0] }
  0x31   :  { %1348 = vmatpush.bf16.msrb.mxu1 %v2839_v16  ;;  %v2806_v32 = vld [vmem:[#allocation2 + $0x560] sm:$0xf]  ;;  %v2679_v39 = vor.u32 %v3213_v31, %v2678_v30  ;;  %v3241_v47 = vld [vmem:[#allocation2 + $0x54c] sm:$0xf0]  ;;  %v3075_v0 = vld [vmem:[#allocation2 + $0x24] sm:$0xf]  ;;  %v2283_v4 = vor.u32 %v3111_v53, %v2280_v56 }
  0x32   :  { %1389 = vmatpush.bf16.msra.mxu2 %v2347_v12  ;;  %v2807_v42 = vor.u32 %v3245_v33, %v2806_v32  ;;  %v2662_v44 = vld [vmem:[#allocation2 + $0x440] sm:$0xf]  ;;  %v3205_v61 = vld [vmem:[#allocation2 + $0x42c] sm:$0xf0]  ;;  %v2136_v1 = vld [vmem:[#allocation2 + $0x30] sm:$0xf0] }
  0x33   :  { %1376 = vmatpush.bf16.msrb.mxu3 %v2203_v17  ;;  %v2790_v46 = vld [vmem:[#allocation2 + $0x540] sm:$0xf]  ;;  %v2663_v52 = vor.u32 %v3209_v45, %v2662_v44  ;;  %v3237_v63 = vld [vmem:[#allocation2 + $0x52c] sm:$0xf0]  ;;  %v3107_v2 = vld [vmem:[#allocation2 + $0x124] sm:$0xf]  ;;  %v2139_v11 = vor.u32 %v3075_v0, %v2136_v1 }
  0x34   :  { %1335 = vmatpush.bf16.msrb.mxu0 %v2695_v25  ;;  %v2791_v57 = vor.u32 %v3241_v47, %v2790_v46  ;;  %v2646_v59 = vld [vmem:[#allocation2 + $0x420] sm:$0xf]  ;;  %v2264_v3 = vld [vmem:[#allocation2 + $0x130] sm:$0xf0]  ;;  %v3201_v7 = vld [vmem:[#allocation2 + $0x40c] sm:$0xf0] }
  0x35   :  { %1349 = vmatpush.bf16.msrb.mxu1 %v2823_v28  ;;  %v2774_v62 = vld [vmem:[#allocation2 + $0x520] sm:$0xf]  ;;  %v2647_v5 = vor.u32 %v3205_v61, %v2646_v59  ;;  %v3233_v12 = vld [vmem:[#allocation2 + $0x50c] sm:$0xf0]  ;;  %v3071_v13 = vld [vmem:[#allocation2 + $0x4] sm:$0xf]  ;;  %v2267_v21 = vor.u32 %v3107_v2, %v2264_v3 }
  0x36   :  { %1390 = vmatpush.bf16.msra.mxu2 %v2331_v24  ;;  %v2630_v6 = vld [vmem:[#allocation2 + $0x400] sm:$0xf]  ;;  %v2775_v10 = vor.u32 %v3237_v63, %v2774_v62  ;;  %v2120_v14 = vld [vmem:[#allocation2 + $0x10] sm:$0xf0]  ;;  %v3163_v15 = vld [vmem:[#allocation2 + $0x2e4] sm:$0xf] }
  0x37   :  { %1377 = vmatpush.bf16.msrb.mxu3 %v2187_v29  ;;  %v2758_v9 = vld [vmem:[#allocation2 + $0x500] sm:$0xf]  ;;  %v2488_v16 = vld [vmem:[#allocation2 + $0x2f0] sm:$0xf0]  ;;  %v3195_v17 = vld [vmem:[#allocation2 + $0x3e4] sm:$0xf]  ;;  %v2631_v22 = vor.u32 %v3201_v7, %v2630_v6  ;;  %v2123_v27 = vor.u32 %v3071_v13, %v2120_v14 }
  0x38   :  { %1336 = vmatpush.bf16.msrb.mxu0 %v2679_v39  ;;  %v2616_v18 = vld [vmem:[#allocation2 + $0x3f0] sm:$0xf0]  ;;  %v3227_v19 = vld [vmem:[#allocation2 + $0x4e4] sm:$0xf]  ;;  %v2106_v23 = vld [vmem:[%s3613_s0 + $0x10] sm:$0xf]  ;;  %v2759_v26 = vor.u32 %v3233_v12, %v2758_v9  ;;  %v2491_v31 = vor.u32 %v3163_v15, %v2488_v16 }
  0x39   :  { %1350 = vmatpush.bf16.msrb.mxu1 %v2807_v42  ;;  %2900 = vmatmul.msk.bf16.vlgmr.msrb.gmra.mxu2 %vm1272_vm0, %v3426_v50  ;;  %v2744_v20 = vld [vmem:[#allocation2 + $0x4f0] sm:$0xf0]  ;;  %v3069_v24 = vld [vmem:[%s3613_s0 + $0x28] sm:$0xf0]  ;;  %v3103_v25 = vld [vmem:[#allocation2 + $0x104] sm:$0xf]  ;;  %v2619_v32 = vor.u32 %v3195_v17, %v2616_v18 }
  0x3a   :  { %1391 = vmatpush.bf16.msra.mxu2 %v2315_v38  ;;  %v2248_v28 = vld [vmem:[#allocation2 + $0x110] sm:$0xf0]  ;;  %v2108_v30 = vld [vmem:[%s3613_s0 + $0x2c] sm:$0xf0]  ;;  %v3259_v33 = vld [vmem:[#allocation2 + $0x5e4] sm:$0xf]  ;;  %v2747_v36 = vor.u32 %v3227_v19, %v2744_v20  ;;  %v3442_v37 = vor.u32 %v3069_v24, %v2106_v23 }
  0x3b   :  { %1378 = vmatpush.bf16.msrb.mxu3 %v2171_v43  ;;  %v3066_v29 = vld [vmem:[%s3613_s0 + $0x14] sm:$0xf]  ;;  %v3159_v35 = vld [vmem:[#allocation2 + $0x2c4] sm:$0xf]  ;;  %v2251_v41 = vor.u32 %v3103_v25, %v2248_v28 }
  0x3c   :  { %1337 = vmatpush.bf16.msrb.mxu0 %v2663_v52  ;;  %v2872_v34 = vld [vmem:[#allocation2 + $0x5f0] sm:$0xf0]  ;;  %v3191_v39 = vld [vmem:[#allocation2 + $0x3c4] sm:$0xf]  ;;  %v3444_v42 = vor.u32 %v3066_v29, %v2108_v30 }
  0x3d   :  { %1351 = vmatpush.bf16.msrb.mxu1 %v2791_v57  ;;  %v2472_v38 = vld [vmem:[#allocation2 + $0x2d0] sm:$0xf0]  ;;  %v3223_v43 = vld [vmem:[#allocation2 + $0x4c4] sm:$0xf]  ;;  %v2875_v45 = vor.u32 %v3259_v33, %v2872_v34 }
  0x3e   :  { %1392 = vmatpush.bf16.msra.mxu2 %v2299_v51  ;;  %v2600_v40 = vld [vmem:[#allocation2 + $0x3d0] sm:$0xf0]  ;;  %v2475_v46 = vor.u32 %v3159_v35, %v2472_v38  ;;  %v3255_v48 = vld [vmem:[#allocation2 + $0x5c4] sm:$0xf] }
  0x3f   :  { %1379 = vmatpush.bf16.msrb.mxu3 %v2155_v58  ;;  %v2728_v44 = vld [vmem:[#allocation2 + $0x4d0] sm:$0xf0]  ;;  %v2603_v47 = vor.u32 %v3191_v39, %v2600_v40  ;;  %v3155_v51 = vld [vmem:[#allocation2 + $0x2a4] sm:$0xf] }
  0x40   :  { %1338 = vmatpush.bf16.msrb.mxu0 %v2647_v5  ;;  %v2856_v49 = vld [vmem:[#allocation2 + $0x5d0] sm:$0xf0]  ;;  %v2731_v52 = vor.u32 %v3223_v43, %v2728_v44  ;;  %v3187_v56 = vld [vmem:[#allocation2 + $0x3a4] sm:$0xf] }
  0x41   :  { %1352 = vmatpush.bf16.msrb.mxu1 %v2775_v10  ;;  %v2456_v53 = vld [vmem:[#allocation2 + $0x2b0] sm:$0xf0]  ;;  %v3219_v58 = vld [vmem:[#allocation2 + $0x4a4] sm:$0xf]  ;;  %v2859_v61 = vor.u32 %v3255_v48, %v2856_v49 }
  0x42   :  { %1393 = vmatpush.bf16.msra.mxu2 %v2283_v4  ;;  %v2584_v57 = vld [vmem:[#allocation2 + $0x3b0] sm:$0xf0]  ;;  %v2459_v62 = vor.u32 %v3155_v51, %v2456_v53  ;;  %v3251_v0 = vld [vmem:[#allocation2 + $0x5a4] sm:$0xf] }
  0x43   :  { %1380 = vmatpush.bf16.msrb.mxu3 %v2139_v11  ;;  %v2712_v59 = vld [vmem:[#allocation2 + $0x4b0] sm:$0xf0]  ;;  %v2587_v63 = vor.u32 %v3187_v56, %v2584_v57  ;;  %v3151_v2 = vld [vmem:[#allocation2 + $0x284] sm:$0xf] }
  0x44   :  { %1339 = vmatpush.bf16.msrb.mxu0 %v2631_v22  ;;  %v2840_v1 = vld [vmem:[#allocation2 + $0x5b0] sm:$0xf0]  ;;  %v2715_v3 = vor.u32 %v3219_v58, %v2712_v59  ;;  %v3183_v5 = vld [vmem:[#allocation2 + $0x384] sm:$0xf] }
  0x45   :  { %1353 = vmatpush.bf16.msrb.mxu1 %v2759_v26  ;;  %v2440_v4 = vld [vmem:[#allocation2 + $0x290] sm:$0xf0]  ;;  %v3215_v7 = vld [vmem:[#allocation2 + $0x484] sm:$0xf]  ;;  %v2843_v10 = vor.u32 %v3251_v0, %v2840_v1  ;;  %v2238_v0 = vld [vmem:[#allocation2 + $0xe8] sm:$0xf] }
  0x46   :  { %1394 = vmatpush.bf16.msra.mxu2 %v2267_v21  ;;  %v2568_v6 = vld [vmem:[#allocation2 + $0x390] sm:$0xf0]  ;;  %v2443_v11 = vor.u32 %v3151_v2, %v2440_v4  ;;  %v3247_v13 = vld [vmem:[#allocation2 + $0x584] sm:$0xf]  ;;  %v3102_v1 = vld [vmem:[#allocation2 + $0xf4] sm:$0xf0] }
  0x47   :  { %1381 = vmatpush.bf16.msrb.mxu3 %v2123_v27  ;;  %1340 = vmatmul.bf16.vlgmr.msrb.gmra.mxu0 %v3442_v37  ;;  %v2696_v9 = vld [vmem:[#allocation2 + $0x490] sm:$0xf0]  ;;  %v2571_v12 = vor.u32 %v3183_v5, %v2568_v6  ;;  %v3147_v15 = vld [vmem:[#allocation2 + $0x264] sm:$0xf]  ;;  %v2366_v2 = vld [vmem:[#allocation2 + $0x1e8] sm:$0xf] }
  0x48   :  { %1402 = vmatpush.bf16.msra.mxu0 %v2491_v31  ;;  %1354 = vmatmul.bf16.vlgmr.msrb.gmra.mxu1 %v3444_v42  ;;  %v2824_v14 = vld [vmem:[#allocation2 + $0x590] sm:$0xf0]  ;;  %v2699_v16 = vor.u32 %v3215_v7, %v2696_v9  ;;  %v3179_v18 = vld [vmem:[#allocation2 + $0x364] sm:$0xf]  ;;  %v3134_v4 = vld [vmem:[#allocation2 + $0x1f4] sm:$0xf0] }
  0x49   :  { %1416 = vmatpush.bf16.msra.mxu1 %v2619_v32  ;;  %v2424_v17 = vld [vmem:[#allocation2 + $0x270] sm:$0xf0]  ;;  %v3211_v20 = vld [vmem:[#allocation2 + $0x464] sm:$0xf]  ;;  %v2827_v22 = vor.u32 %v3247_v13, %v2824_v14  ;;  %v2239_v13 = vor.u32 %v3102_v1, %v2238_v0  ;;  %v2494_v14 = vld [vmem:[#allocation2 + $0x2e8] sm:$0xf] }
  0x4a   :  { %1395 = vmatpush.bf16.msra.mxu2 %v2251_v41  ;;  %1382 = vmatmul.bf16.vlgmr.msrb.gmra.mxu3 %v3404_v55  ;;  %v2552_v19 = vld [vmem:[#allocation2 + $0x370] sm:$0xf0]  ;;  %v2427_v23 = vor.u32 %v3147_v15, %v2424_v17  ;;  %v3243_v25 = vld [vmem:[#allocation2 + $0x564] sm:$0xf]  ;;  %v3166_v15 = vld [vmem:[#allocation2 + $0x2f4] sm:$0xf0]  ;;  %v2367_v17 = vor.u32 %v3134_v4, %v2366_v2 }
  0x4b   :  { %1430 = vmatpush.bf16.msra.mxu3 %v2747_v36  ;;  %v2680_v21 = vld [vmem:[#allocation2 + $0x470] sm:$0xf0]  ;;  %v2555_v24 = vor.u32 %v3179_v18, %v2552_v19  ;;  %v3143_v27 = vld [vmem:[#allocation2 + $0x244] sm:$0xf]  ;;  %v3198_v19 = vld [vmem:[#allocation2 + $0x3f4] sm:$0xf0] }
  0x4c   :  { %1403 = vmatpush.bf16.msra.mxu0 %v2475_v46  ;;  %v2808_v26 = vld [vmem:[#allocation2 + $0x570] sm:$0xf0]  ;;  %v2683_v28 = vor.u32 %v3211_v20, %v2680_v21  ;;  %v3175_v30 = vld [vmem:[#allocation2 + $0x344] sm:$0xf]  ;;  %v2222_v20 = vld [vmem:[#allocation2 + $0xc8] sm:$0xf] }
  0x4d   :  { %1417 = vmatpush.bf16.msra.mxu1 %v2603_v47  ;;  %1396 = vmatmul.bf16.vlgmr.msra.gmra.mxu2 %v3416_v8  ;;  %v2408_v29 = vld [vmem:[#allocation2 + $0x250] sm:$0xf0]  ;;  %v3207_v32 = vld [vmem:[#allocation2 + $0x444] sm:$0xf]  ;;  %v2811_v34 = vor.u32 %v3243_v25, %v2808_v26  ;;  %v3098_v21 = vld [vmem:[#allocation2 + $0xd4] sm:$0xf0]  ;;  %v2495_v25 = vor.u32 %v3166_v15, %v2494_v14 }
  0x4e   :  { %1444 = vmatpush.bf16.msrb.mxu2 %v2875_v45  ;;  %v2536_v31 = vld [vmem:[#allocation2 + $0x350] sm:$0xf0]  ;;  %v2411_v35 = vor.u32 %v3143_v27, %v2408_v29  ;;  %v3239_v38 = vld [vmem:[#allocation2 + $0x544] sm:$0xf]  ;;  %v2223_v27 = vor.u32 %v3098_v21, %v2222_v20  ;;  %v3162_v29 = vld [vmem:[#allocation2 + $0x2d4] sm:$0xf0] }
  0x4f   :  { %1431 = vmatpush.bf16.msra.mxu3 %v2731_v52  ;;  %v2664_v33 = vld [vmem:[#allocation2 + $0x450] sm:$0xf0]  ;;  %v2539_v36 = vor.u32 %v3175_v30, %v2536_v31  ;;  %v3139_v40 = vld [vmem:[#allocation2 + $0x224] sm:$0xf]  ;;  %v2606_v30 = vld [vmem:[#allocation2 + $0x3c8] sm:$0xf] }
  0x50   :  { %1404 = vmatpush.bf16.msra.mxu0 %v2459_v62  ;;  %v2792_v39 = vld [vmem:[#allocation2 + $0x550] sm:$0xf0]  ;;  %v2667_v41 = vor.u32 %v3207_v32, %v2664_v33  ;;  %v3171_v44 = vld [vmem:[#allocation2 + $0x324] sm:$0xf]  ;;  %v3194_v32 = vld [vmem:[#allocation2 + $0x3d4] sm:$0xf0] }
  0x51   :  { %1418 = vmatpush.bf16.msra.mxu1 %v2587_v63  ;;  %v2392_v43 = vld [vmem:[#allocation2 + $0x230] sm:$0xf0]  ;;  %v3203_v46 = vld [vmem:[#allocation2 + $0x424] sm:$0xf]  ;;  %v2795_v48 = vor.u32 %v3239_v38, %v2792_v39  ;;  %v2206_v33 = vld [vmem:[#allocation2 + $0xa8] sm:$0xf]  ;;  %v2607_v39 = vor.u32 %v3194_v32, %v2606_v30 }
  0x52   :  { %1445 = vmatpush.bf16.msrb.mxu2 %v2859_v61  ;;  %v2520_v45 = vld [vmem:[#allocation2 + $0x330] sm:$0xf0]  ;;  %v3235_v49 = vld [vmem:[#allocation2 + $0x524] sm:$0xf]  ;;  %v2395_v52 = vor.u32 %v3139_v40, %v2392_v43  ;;  %v3158_v43 = vld [vmem:[#allocation2 + $0x2b4] sm:$0xf0] }
  0x53   :  { %1432 = vmatpush.bf16.msra.mxu3 %v2715_v3  ;;  %v2648_v47 = vld [vmem:[#allocation2 + $0x430] sm:$0xf0]  ;;  %v2523_v53 = vor.u32 %v3171_v44, %v2520_v45  ;;  %v3135_v56 = vld [vmem:[#allocation2 + $0x204] sm:$0xf]  ;;  %v2590_v44 = vld [vmem:[#allocation2 + $0x3a8] sm:$0xf] }
  0x54   :  { %1405 = vmatpush.bf16.msra.mxu0 %v2443_v11  ;;  %v2776_v51 = vld [vmem:[#allocation2 + $0x530] sm:$0xf0]  ;;  %v3167_v58 = vld [vmem:[#allocation2 + $0x304] sm:$0xf]  ;;  %v2651_v59 = vor.u32 %v3203_v46, %v2648_v47  ;;  %v3190_v46 = vld [vmem:[#allocation2 + $0x3b4] sm:$0xf0] }
  0x55   :  { %1419 = vmatpush.bf16.msra.mxu1 %v2571_v12  ;;  %v2376_v57 = vld [vmem:[#allocation2 + $0x210] sm:$0xf0]  ;;  %v3199_v62 = vld [vmem:[#allocation2 + $0x404] sm:$0xf]  ;;  %v2779_v3 = vor.u32 %v3235_v49, %v2776_v51  ;;  %v2190_v47 = vld [vmem:[#allocation2 + $0x88] sm:$0xf] }
  0x56   :  { %1446 = vmatpush.bf16.msrb.mxu2 %v2843_v10  ;;  %v2504_v61 = vld [vmem:[#allocation2 + $0x310] sm:$0xf0]  ;;  %v3263_v5 = vld [vmem:[#allocation2 + $0x604] sm:$0xf]  ;;  %v2379_v7 = vor.u32 %v3135_v56, %v2376_v57  ;;  %v2318_v49 = vld [vmem:[#allocation2 + $0x188] sm:$0xf]  ;;  %v2591_v56 = vor.u32 %v3190_v46, %v2590_v44 }
  0x57   :  { %1433 = vmatpush.bf16.msra.mxu3 %v2699_v16  ;;  %v2632_v63 = vld [vmem:[#allocation2 + $0x410] sm:$0xf0]  ;;  %v2507_v9 = vor.u32 %v3167_v58, %v2504_v61  ;;  %v3231_v10 = vld [vmem:[#allocation2 + $0x504] sm:$0xf]  ;;  %v2622_v16 = vld [vmem:[#allocation2 + $0x3e8] sm:$0xf] }
  0x58   :  { %1406 = vmatpush.bf16.msra.mxu0 %v2427_v23  ;;  %v2888_v6 = vld [vmem:[#allocation2 + $0x610] sm:$0xf0]  ;;  %v2635_v12 = vor.u32 %v3199_v62, %v2632_v63  ;;  %v2350_v23 = vld [vmem:[#allocation2 + $0x1c8] sm:$0xf]  ;;  %v2623_v26 = vor.u32 %v3198_v19, %v2622_v16  ;;  %v3122_v51 = vld [vmem:[#allocation2 + $0x194] sm:$0xf0] }
  0x59   :  { %1420 = vmatpush.bf16.msra.mxu1 %v2555_v24  ;;  %v2760_v11 = vld [vmem:[#allocation2 + $0x510] sm:$0xf0]  ;;  %v2891_v18 = vor.u32 %v3263_v5, %v2888_v6  ;;  %v3130_v24 = vld [vmem:[#allocation2 + $0x1d4] sm:$0xf0]  ;;  %v2319_v62 = vor.u32 %v3122_v51, %v2318_v49  ;;  %v2174_v63 = vld [vmem:[#allocation2 + $0x68] sm:$0xf] }
  0x5a   :  { %1447 = vmatpush.bf16.msrb.mxu2 %v2827_v22  ;;  %v2763_v22 = vor.u32 %v3231_v10, %v2760_v11  ;;  %v2351_v31 = vor.u32 %v3130_v24, %v2350_v23  ;;  %v3154_v58 = vld [vmem:[#allocation2 + $0x294] sm:$0xf0]  ;;  %v2302_v1 = vld [vmem:[#allocation2 + $0x168] sm:$0xf] }
  0x5b   :  { %1434 = vmatpush.bf16.msra.mxu3 %v2683_v28  ;;  %v2478_v28 = vld [vmem:[#allocation2 + $0x2c8] sm:$0xf]  ;;  %v3186_v61 = vld [vmem:[#allocation2 + $0x394] sm:$0xf0] }
  0x5c   :  { %1407 = vmatpush.bf16.msra.mxu0 %v2411_v35  ;;  %v2334_v35 = vld [vmem:[#allocation2 + $0x1a8] sm:$0xf]  ;;  %v2479_v38 = vor.u32 %v3162_v29, %v2478_v28  ;;  %v3086_v0 = vld [vmem:[#allocation2 + $0x74] sm:$0xf0] }
  0x5d   :  { %1421 = vmatpush.bf16.msra.mxu1 %v2539_v36  ;;  %v3126_v36 = vld [vmem:[#allocation2 + $0x1b4] sm:$0xf0]  ;;  %v2175_v5 = vor.u32 %v3086_v0, %v2174_v63  ;;  %v2430_v6 = vld [vmem:[#allocation2 + $0x268] sm:$0xf] }
  0x5e   :  { %1448 = vmatpush.bf16.msrb.mxu2 %v2811_v34  ;;  %v3094_v34 = vld [vmem:[#allocation2 + $0xb4] sm:$0xf0]  ;;  %v2335_v45 = vor.u32 %v3126_v36, %v2334_v35  ;;  %v2286_v14 = vld [vmem:[#allocation2 + $0x148] sm:$0xf] }
  0x5f   :  { %1435 = vmatpush.bf16.msra.mxu3 %v2667_v41  ;;  %v2207_v40 = vor.u32 %v3094_v34, %v2206_v33  ;;  %v2462_v41 = vld [vmem:[#allocation2 + $0x2a8] sm:$0xf]  ;;  %v3118_v2 = vld [vmem:[#allocation2 + $0x174] sm:$0xf0] }
  0x60   :  { %1408 = vmatpush.bf16.msra.mxu0 %v2395_v52  ;;  %v2463_v52 = vor.u32 %v3158_v43, %v2462_v41  ;;  %v2303_v10 = vor.u32 %v3118_v2, %v2302_v1  ;;  %v3182_v11 = vld [vmem:[#allocation2 + $0x374] sm:$0xf0]  ;;  %v2414_v19 = vld [vmem:[#allocation2 + $0x248] sm:$0xf] }
  0x61   :  { %1422 = vmatpush.bf16.msra.mxu1 %v2523_v53  ;;  %v2446_v53 = vld [vmem:[#allocation2 + $0x288] sm:$0xf]  ;;  %v3114_v15 = vld [vmem:[#allocation2 + $0x154] sm:$0xf0] }
  0x62   :  { %1449 = vmatpush.bf16.msrb.mxu2 %v2795_v48  ;;  %v3090_v48 = vld [vmem:[#allocation2 + $0x94] sm:$0xf0]  ;;  %v2542_v21 = vld [vmem:[#allocation2 + $0x348] sm:$0xf] }
  0x63   :  { %1436 = vmatpush.bf16.msra.mxu3 %v2651_v59  ;;  %v2191_v57 = vor.u32 %v3090_v48, %v2190_v47  ;;  %v2574_v59 = vld [vmem:[#allocation2 + $0x388] sm:$0xf]  ;;  %v3146_v20 = vld [vmem:[#allocation2 + $0x254] sm:$0xf0] }
  0x64   :  { %1409 = vmatpush.bf16.msra.mxu0 %v2379_v7  ;;  %v2575_v4 = vor.u32 %v3186_v61, %v2574_v59  ;;  %v3150_v7 = vld [vmem:[#allocation2 + $0x274] sm:$0xf0]  ;;  %v2142_v24 = vld [vmem:[#allocation2 + $0x28] sm:$0xf]  ;;  %v2415_v28 = vor.u32 %v3146_v20, %v2414_v19  ;;  %v2240_v59 = vld [vmem:[#allocation2 + $0xf8] sm:$0xf0] }
  0x65   :  { %1423 = vmatpush.bf16.msra.mxu1 %v2507_v9  ;;  %v2558_v9 = vld [vmem:[#allocation2 + $0x368] sm:$0xf]  ;;  %v2431_v16 = vor.u32 %v3150_v7, %v2430_v6  ;;  %v3178_v23 = vld [vmem:[#allocation2 + $0x354] sm:$0xf0] }
  0x66   :  { %1450 = vmatpush.bf16.msrb.mxu2 %v2779_v3  ;;  %v2447_v3 = vor.u32 %v3154_v58, %v2446_v53  ;;  %v2398_v29 = vld [vmem:[#allocation2 + $0x228] sm:$0xf]  ;;  %v2543_v30 = vor.u32 %v3178_v23, %v2542_v21  ;;  %v3142_v32 = vld [vmem:[#allocation2 + $0x234] sm:$0xf0]  ;;  %v3100_v58 = vld [vmem:[#allocation2 + $0xec] sm:$0xf] }
  0x67   :  { %1437 = vmatpush.bf16.msra.mxu3 %v2635_v12  ;;  %1410 = vmatmul.bf16.vlgmr.msra.gmra.mxu0 %v3402_v54  ;;  %v2158_v12 = vld [vmem:[#allocation2 + $0x48] sm:$0xf]  ;;  %v3174_v34 = vld [vmem:[#allocation2 + $0x334] sm:$0xf0]  ;;  %v2399_v44 = vor.u32 %v3142_v32, %v2398_v29  ;;  %v2243_v6 = vor.u32 %v3100_v58, %v2240_v59  ;;  %v2352_v23 = vld [vmem:[#allocation2 + $0x1d8] sm:$0xf0] }
  0x68   :  { %1465 = vmatpush.bf16.msrb.mxu0 %v2891_v18  ;;  %1424 = vmatmul.bf16.vlgmr.msra.gmra.mxu1 %v3406_v60  ;;  %v2526_v33 = vld [vmem:[#allocation2 + $0x328] sm:$0xf]  ;;  %v3230_v43 = vld [vmem:[#allocation2 + $0x4f4] sm:$0xf0] }
  0x69   :  { %1472 = vmatpush.bf16.msrb.mxu1 %v2239_v13  ;;  %v3082_v13 = vld [vmem:[#allocation2 + $0x54] sm:$0xf0]  ;;  %v2126_v36 = vld [vmem:[#allocation2 + $0x8] sm:$0xf]  ;;  %v2527_v47 = vor.u32 %v3174_v34, %v2526_v33  ;;  %v3124_v34 = vld [vmem:[#allocation2 + $0x1ac] sm:$0xf] }
  0x6a   :  { %1451 = vmatpush.bf16.msrb.mxu2 %v2763_v22  ;;  %1438 = vmatmul.bf16.vlgmr.msra.gmra.mxu3 %v3442_v37  ;;  %v2159_v18 = vor.u32 %v3082_v13, %v2158_v12  ;;  %v2287_v22 = vor.u32 %v3114_v15, %v2286_v14  ;;  %v2750_v41 = vld [vmem:[#allocation2 + $0x4e8] sm:$0xf]  ;;  %v3262_v46 = vld [vmem:[#allocation2 + $0x5f4] sm:$0xf0]  ;;  %v2224_v14 = vld [vmem:[#allocation2 + $0xd8] sm:$0xf0] }
  0x6b   :  { %1486 = vmatpush.bf16.msrb.mxu3 %v2367_v17  ;;  %v2559_v17 = vor.u32 %v3182_v11, %v2558_v9  ;;  %v2382_v49 = vld [vmem:[#allocation2 + $0x208] sm:$0xf]  ;;  %v3138_v51 = vld [vmem:[#allocation2 + $0x214] sm:$0xf0]  ;;  %v3132_v9 = vld [vmem:[#allocation2 + $0x1ec] sm:$0xf] }
  0x6c   :  { %1500 = vmatpush.bf16.msra.mxu0 %v2495_v25  ;;  %v3078_v25 = vld [vmem:[#allocation2 + $0x34] sm:$0xf0]  ;;  %v2862_v0 = vld [vmem:[#allocation2 + $0x5c8] sm:$0xf]  ;;  %v2383_v1 = vor.u32 %v3138_v51, %v2382_v49  ;;  %v3096_v11 = vld [vmem:[#allocation2 + $0xcc] sm:$0xf] }
  0x6d   :  { %1473 = vmatpush.bf16.msrb.mxu1 %v2223_v27  ;;  %1452 = vmatmul.bf16.vlgmr.msrb.gmra.mxu2 %v3444_v42  ;;  %v3110_v27 = vld [vmem:[#allocation2 + $0x134] sm:$0xf0]  ;;  %v2718_v15 = vld [vmem:[#allocation2 + $0x4a8] sm:$0xf]  ;;  %v2227_v20 = vor.u32 %v3096_v11, %v2224_v14  ;;  %v2320_v49 = vld [vmem:[#allocation2 + $0x198] sm:$0xf0] }
  0x6e   :  { %1514 = vmatpush.bf16.msra.mxu2 %v2623_v26  ;;  %v2270_v26 = vld [vmem:[#allocation2 + $0x128] sm:$0xf]  ;;  %v3226_v63 = vld [vmem:[#allocation2 + $0x4d4] sm:$0xf0]  ;;  %v3084_v51 = vld [vmem:[#allocation2 + $0x6c] sm:$0xf] }
  0x6f   :  { %1487 = vmatpush.bf16.msrb.mxu3 %v2351_v31  ;;  %v2143_v31 = vor.u32 %v3078_v25, %v2142_v24  ;;  %v2271_v35 = vor.u32 %v3110_v27, %v2270_v26  ;;  %v3258_v2 = vld [vmem:[#allocation2 + $0x5d4] sm:$0xf0]  ;;  %v3092_v24 = vld [vmem:[#allocation2 + $0xac] sm:$0xf]  ;;  %v2208_v26 = vld [vmem:[#allocation2 + $0xb8] sm:$0xf0] }
  0x70   :  { %1501 = vmatpush.bf16.msra.mxu0 %v2479_v38  ;;  %v3074_v38 = vld [vmem:[#allocation2 + $0x14] sm:$0xf0]  ;;  %v2863_v12 = vor.u32 %v3258_v2, %v2862_v0  ;;  %v2702_v27 = vld [vmem:[#allocation2 + $0x488] sm:$0xf]  ;;  %v2211_v32 = vor.u32 %v3092_v24, %v2208_v26  ;;  %v3116_v0 = vld [vmem:[#allocation2 + $0x16c] sm:$0xf] }
  0x71   :  { %1474 = vmatpush.bf16.msrb.mxu1 %v2207_v40  ;;  %v3106_v40 = vld [vmem:[#allocation2 + $0x114] sm:$0xf0]  ;;  %v2127_v48 = vor.u32 %v3074_v38, %v2126_v36  ;;  %v2830_v29 = vld [vmem:[#allocation2 + $0x588] sm:$0xf]  ;;  %v3088_v36 = vld [vmem:[#allocation2 + $0x8c] sm:$0xf] }
  0x72   :  { %1515 = vmatpush.bf16.msra.mxu2 %v2607_v39  ;;  %v2254_v39 = vld [vmem:[#allocation2 + $0x108] sm:$0xf]  ;;  %v3242_v59 = vld [vmem:[#allocation2 + $0x554] sm:$0xf0]  ;;  %v3080_v2 = vld [vmem:[#allocation2 + $0x4c] sm:$0xf] }
  0x73   :  { %1488 = vmatpush.bf16.msrb.mxu3 %v2335_v45  ;;  %v2878_v45 = vld [vmem:[#allocation2 + $0x5e8] sm:$0xf]  ;;  %v2255_v53 = vor.u32 %v3106_v40, %v2254_v39  ;;  %v2192_v39 = vld [vmem:[#allocation2 + $0x98] sm:$0xf0]  ;;  %v3112_v11 = vld [vmem:[#allocation2 + $0x14c] sm:$0xf] }
  0x74   :  { %1502 = vmatpush.bf16.msra.mxu0 %v2463_v52  ;;  %v2510_v52 = vld [vmem:[#allocation2 + $0x308] sm:$0xf]  ;;  %v2879_v61 = vor.u32 %v3262_v46, %v2878_v45  ;;  %v2195_v46 = vor.u32 %v3088_v36, %v2192_v39  ;;  %v2288_v14 = vld [vmem:[#allocation2 + $0x158] sm:$0xf0]  ;;  %v3160_v39 = vld [vmem:[#allocation2 + $0x2cc] sm:$0xf] }
  0x75   :  { %1475 = vmatpush.bf16.msrb.mxu1 %v2191_v57  ;;  %v3170_v57 = vld [vmem:[#allocation2 + $0x314] sm:$0xf0]  ;;  %v2686_v40 = vld [vmem:[#allocation2 + $0x468] sm:$0xf]  ;;  %v2291_v24 = vor.u32 %v3112_v11, %v2288_v14  ;;  %v2624_v26 = vld [vmem:[#allocation2 + $0x3f8] sm:$0xf0] }
  0x76   :  { %1516 = vmatpush.bf16.msra.mxu2 %v2591_v56  ;;  %v2751_v56 = vor.u32 %v3230_v43, %v2750_v41  ;;  %v3214_v41 = vld [vmem:[#allocation2 + $0x474] sm:$0xf0]  ;;  %v2814_v43 = vld [vmem:[#allocation2 + $0x568] sm:$0xf]  ;;  %v3184_v11 = vld [vmem:[#allocation2 + $0x38c] sm:$0xf] }
  0x77   :  { %1489 = vmatpush.bf16.msrb.mxu3 %v2319_v62  ;;  %2901 = vmatmul.msk.bf16.vlgmr.msrb.gmra.mxu0 %vm1272_vm0, %v3426_v50  ;;  %v2734_v62 = vld [vmem:[#allocation2 + $0x4c8] sm:$0xf] }
  0x78   :  { %1503 = vmatpush.bf16.msra.mxu0 %v2447_v3  ;;  %v2894_v3 = vld [vmem:[#allocation2 + $0x608] sm:$0xf]  ;;  %v2735_v7 = vor.u32 %v3226_v63, %v2734_v62 }
  0x79   :  { %1476 = vmatpush.bf16.msrb.mxu1 %v2175_v5  ;;  %v2511_v5 = vor.u32 %v3170_v57, %v2510_v52  ;;  %v3210_v57 = vld [vmem:[#allocation2 + $0x454] sm:$0xf0]  ;;  %v2798_v58 = vld [vmem:[#allocation2 + $0x548] sm:$0xf] }
  0x7a   :  { %1517 = vmatpush.bf16.msra.mxu2 %v2575_v4  ;;  %v3266_v4 = vld [vmem:[#allocation2 + $0x614] sm:$0xf0] }
  0x7b   :  { %1490 = vmatpush.bf16.msrb.mxu3 %v2303_v10  ;;  %v2368_v10 = vld [vmem:[#allocation2 + $0x1f8] sm:$0xf0]  ;;  %v2895_v13 = vor.u32 %v3266_v4, %v2894_v3  ;;  %v2799_v3 = vor.u32 %v3242_v59, %v2798_v58  ;;  %v3156_v58 = vld [vmem:[#allocation2 + $0x2ac] sm:$0xf] }
  0x7c   :  { %1504 = vmatpush.bf16.msra.mxu0 %v2431_v16  ;;  %v3222_v16 = vld [vmem:[#allocation2 + $0x4b4] sm:$0xf0]  ;;  %v2371_v19 = vor.u32 %v3132_v9, %v2368_v10  ;;  %v2160_v4 = vld [vmem:[#allocation2 + $0x58] sm:$0xf0] }
  0x7d   :  { %1477 = vmatpush.bf16.msrb.mxu1 %v2159_v18  ;;  %v3254_v18 = vld [vmem:[#allocation2 + $0x5b4] sm:$0xf0]  ;;  %v2719_v21 = vor.u32 %v3222_v16, %v2718_v15  ;;  %v3076_v15 = vld [vmem:[#allocation2 + $0x2c] sm:$0xf]  ;;  %v2144_v16 = vld [vmem:[#allocation2 + $0x38] sm:$0xf0] }
  0x7e   :  { %1518 = vmatpush.bf16.msra.mxu2 %v2559_v17  ;;  %v2846_v17 = vld [vmem:[#allocation2 + $0x5a8] sm:$0xf]  ;;  %v3238_v9 = vld [vmem:[#allocation2 + $0x534] sm:$0xf0]  ;;  %v2464_v59 = vld [vmem:[#allocation2 + $0x2b8] sm:$0xf0] }
  0x7f   :  { %1491 = vmatpush.bf16.msrb.mxu3 %v2287_v22  ;;  %v3128_v22 = vld [vmem:[#allocation2 + $0x1cc] sm:$0xf]  ;;  %v2847_v25 = vor.u32 %v3254_v18, %v2846_v17  ;;  %v2638_v18 = vld [vmem:[#allocation2 + $0x408] sm:$0xf] }
  0x80   :  { %1505 = vmatpush.bf16.msra.mxu0 %v2415_v28  ;;  %v3218_v28 = vld [vmem:[#allocation2 + $0x494] sm:$0xf0] }
  0x81   :  { %1478 = vmatpush.bf16.msrb.mxu1 %v2143_v31  ;;  %v2355_v31 = vor.u32 %v3128_v22, %v2352_v23  ;;  %v2703_v33 = vor.u32 %v3218_v28, %v2702_v27  ;;  %v3164_v22 = vld [vmem:[#allocation2 + $0x2ec] sm:$0xf]  ;;  %v2496_v23 = vld [vmem:[#allocation2 + $0x2f8] sm:$0xf0]  ;;  %v2147_v27 = vor.u32 %v3076_v15, %v2144_v16 }
  0x82   :  { %1519 = vmatpush.bf16.msra.mxu2 %v2543_v30  ;;  %v3250_v30 = vld [vmem:[#allocation2 + $0x594] sm:$0xf0]  ;;  %v3252_v16 = vld [vmem:[#allocation2 + $0x5ac] sm:$0xf] }
  0x83   :  { %1492 = vmatpush.bf16.msrb.mxu3 %v2271_v35  ;;  %v2336_v35 = vld [vmem:[#allocation2 + $0x1b8] sm:$0xf0]  ;;  %v2831_v38 = vor.u32 %v3250_v30, %v2830_v29  ;;  %v3108_v29 = vld [vmem:[#allocation2 + $0x12c] sm:$0xf] }
  0x84   :  { %1506 = vmatpush.bf16.msra.mxu0 %v2399_v44  ;;  %v3246_v44 = vld [vmem:[#allocation2 + $0x574] sm:$0xf0]  ;;  %v2339_v45 = vor.u32 %v3124_v34, %v2336_v35  ;;  %v2272_v30 = vld [vmem:[#allocation2 + $0x138] sm:$0xf0]  ;;  %v3228_v35 = vld [vmem:[#allocation2 + $0x4ec] sm:$0xf] }
  0x85   :  { %1479 = vmatpush.bf16.msrb.mxu1 %v2127_v48  ;;  %v3120_v48 = vld [vmem:[#allocation2 + $0x18c] sm:$0xf]  ;;  %v2815_v52 = vor.u32 %v3246_v44, %v2814_v43  ;;  %v2128_v34 = vld [vmem:[#allocation2 + $0x18] sm:$0xf0] }
  0x86   :  { %1520 = vmatpush.bf16.msra.mxu2 %v2527_v47  ;;  %v2687_v47 = vor.u32 %v3214_v41, %v2686_v40  ;;  %v2480_v40 = vld [vmem:[#allocation2 + $0x2d8] sm:$0xf0]  ;;  %v2275_v41 = vor.u32 %v3108_v29, %v2272_v30  ;;  %v3192_v43 = vld [vmem:[#allocation2 + $0x3cc] sm:$0xf] }
  0x87   :  { %1493 = vmatpush.bf16.msrb.mxu3 %v2255_v53  ;;  %v2176_v53 = vld [vmem:[#allocation2 + $0x78] sm:$0xf0]  ;;  %v3212_v29 = vld [vmem:[#allocation2 + $0x46c] sm:$0xf] }
  0x88   :  { %1507 = vmatpush.bf16.msra.mxu0 %v2383_v1  ;;  %1480 = vmatmul.bf16.vlgmr.msrb.gmra.mxu1 %v3404_v55  ;;  %v2179_v62 = vor.u32 %v3084_v51, %v2176_v53  ;;  %v2304_v1 = vld [vmem:[#allocation2 + $0x178] sm:$0xf0]  ;;  %v3260_v51 = vld [vmem:[#allocation2 + $0x5ec] sm:$0xf] }
  0x89   :  { %1528 = vmatpush.bf16.msra.mxu1 %v2751_v56  ;;  %v2670_v56 = vld [vmem:[#allocation2 + $0x448] sm:$0xf]  ;;  %v2307_v10 = vor.u32 %v3116_v0, %v2304_v1  ;;  %v2608_v44 = vld [vmem:[#allocation2 + $0x3d8] sm:$0xf0]  ;;  %v3224_v53 = vld [vmem:[#allocation2 + $0x4cc] sm:$0xf] }
  0x8a   :  { %1494 = vmatmul.bf16.vlgmr.msrb.gmra.mxu3 %v3416_v8  ;;  %1521 = vmatpush.bf16.msra.mxu2 %v2511_v5  ;;  %v2671_v63 = vor.u32 %v3210_v57, %v2670_v56  ;;  %v2654_v5 = vld [vmem:[#allocation2 + $0x428] sm:$0xf]  ;;  %v2611_v56 = vor.u32 %v3192_v43, %v2608_v44  ;;  %v2736_v57 = vld [vmem:[#allocation2 + $0x4d8] sm:$0xf0] }
  0x8b   :  { %1542 = vmatpush.bf16.msra.mxu3 %v2879_v61  ;;  %1508 = vmatmul.bf16.vlgmr.msra.gmra.mxu0 %v3402_v54  ;;  %v2323_v61 = vor.u32 %v3120_v48, %v2320_v49  ;;  %v2483_v49 = vor.u32 %v3160_v39, %v2480_v40  ;;  %v2739_v1 = vor.u32 %v3224_v53, %v2736_v57  ;;  %v3244_v39 = vld [vmem:[#allocation2 + $0x56c] sm:$0xf]  ;;  %v2816_v40 = vld [vmem:[#allocation2 + $0x578] sm:$0xf0] }
  0x8c   :  { %1563 = vmatpush.bf16.msrb.mxu0 %v2895_v13  ;;  %v2672_v44 = vld [vmem:[#allocation2 + $0x458] sm:$0xf0] }
  0x8d   :  { %1529 = vmatpush.bf16.msra.mxu1 %v2735_v7  ;;  %1522 = vmatmul.bf16.vlgmr.msra.gmra.mxu2 %v3406_v60  ;;  %v2782_v7 = vld [vmem:[#allocation2 + $0x528] sm:$0xf]  ;;  %v2800_v57 = vld [vmem:[#allocation2 + $0x558] sm:$0xf0] }
  0x8e   :  { %1570 = vmatpush.bf16.msrb.mxu2 %v2243_v6  ;;  %v3206_v6 = vld [vmem:[#allocation2 + $0x434] sm:$0xf0]  ;;  %v2783_v17 = vor.u32 %v3238_v9, %v2782_v7  ;;  %v2720_v7 = vld [vmem:[#allocation2 + $0x4b8] sm:$0xf0]  ;;  %v3152_v9 = vld [vmem:[#allocation2 + $0x28c] sm:$0xf] }
  0x8f   :  { %1543 = vmatpush.bf16.msra.mxu3 %v2863_v12  ;;  %v2163_v12 = vor.u32 %v3080_v2, %v2160_v4  ;;  %v2655_v13 = vor.u32 %v3206_v6, %v2654_v5  ;;  %v2467_v2 = vor.u32 %v3156_v58, %v2464_v59  ;;  %v2864_v4 = vld [vmem:[#allocation2 + $0x5d8] sm:$0xf0]  ;;  %v3220_v5 = vld [vmem:[#allocation2 + $0x4ac] sm:$0xf] }
  0x90   :  { %1584 = vmatpush.bf16.msra.mxu0 %v2371_v19  ;;  %v3202_v19 = vld [vmem:[#allocation2 + $0x414] sm:$0xf0]  ;;  %v2723_v14 = vor.u32 %v3220_v5, %v2720_v7  ;;  %v3204_v58 = vld [vmem:[#allocation2 + $0x42c] sm:$0xf]  ;;  %v2656_v59 = vld [vmem:[#allocation2 + $0x438] sm:$0xf0] }
  0x91   :  { %1530 = vmatpush.bf16.msra.mxu1 %v2719_v21  ;;  %v3234_v21 = vld [vmem:[#allocation2 + $0x514] sm:$0xf0]  ;;  %v2639_v28 = vor.u32 %v3202_v19, %v2638_v18  ;;  %v3216_v18 = vld [vmem:[#allocation2 + $0x48c] sm:$0xf]  ;;  %v2896_v5 = vld [vmem:[#allocation2 + $0x618] sm:$0xf0] }
  0x92   :  { %1571 = vmatpush.bf16.msrb.mxu2 %v2227_v20  ;;  %v2766_v20 = vld [vmem:[#allocation2 + $0x508] sm:$0xf] }
  0x93   :  { %1544 = vmatpush.bf16.msra.mxu3 %v2847_v25  ;;  %v3196_v25 = vld [vmem:[#allocation2 + $0x3ec] sm:$0xf] }
  0x94   :  { %1585 = vmatpush.bf16.msra.mxu0 %v2355_v31  ;;  %v2767_v31 = vor.u32 %v3234_v21, %v2766_v20  ;;  %v2627_v36 = vor.u32 %v3196_v25, %v2624_v26  ;;  %v2704_v20 = vld [vmem:[#allocation2 + $0x498] sm:$0xf0]  ;;  %v3148_v21 = vld [vmem:[#allocation2 + $0x26c] sm:$0xf] }
  0x95   :  { %1531 = vmatpush.bf16.msra.mxu1 %v2703_v33  ;;  %v3072_v33 = vld [vmem:[#allocation2 + $0xc] sm:$0xf]  ;;  %v2707_v25 = vor.u32 %v3216_v18, %v2704_v20  ;;  %v3274_v18 = vld [vmem:[%s3616_s3 + $0x38] sm:$0xff] }
  0x96   :  { %1572 = vmatpush.bf16.msrb.mxu2 %v2211_v32  ;;  %v2499_v32 = vor.u32 %v3164_v22, %v2496_v23  ;;  %v2432_v22 = vld [vmem:[#allocation2 + $0x278] sm:$0xf0]  ;;  %v3180_v23 = vld [vmem:[#allocation2 + $0x36c] sm:$0xf] }
  0x97   :  { %1545 = vmatpush.bf16.msra.mxu3 %v2831_v38  ;;  %v2752_v38 = vld [vmem:[#allocation2 + $0x4f8] sm:$0xf0]  ;;  %v2435_v26 = vor.u32 %v3148_v21, %v2432_v22  ;;  %v3232_v21 = vld [vmem:[#allocation2 + $0x50c] sm:$0xf] }
  0x98   :  { %1586 = vmatpush.bf16.msra.mxu0 %v2339_v45  ;;  %v2131_v45 = vor.u32 %v3072_v33, %v2128_v34  ;;  %v2755_v48 = vor.u32 %v3228_v35, %v2752_v38  ;;  %v2416_v33 = vld [vmem:[#allocation2 + $0x258] sm:$0xf0]  ;;  %v3176_v34 = vld [vmem:[#allocation2 + $0x34c] sm:$0xf] }
  0x99   :  { %1532 = vmatpush.bf16.msra.mxu1 %v2687_v47  ;;  %v2256_v47 = vld [vmem:[#allocation2 + $0x118] sm:$0xf0] }
  0x9a   :  { %1573 = vmatpush.bf16.msrb.mxu2 %v2195_v46  ;;  %v3104_v46 = vld [vmem:[#allocation2 + $0x10c] sm:$0xf]  ;;  %v2544_v35 = vld [vmem:[#allocation2 + $0x358] sm:$0xf0] }
  0x9b   :  { %1546 = vmatpush.bf16.msra.mxu3 %v2815_v52  ;;  %2902 = vmatmul.msk.bf16.vlgmr.msrb.gmra.mxu0 %vm1272_vm0, %v3426_v50  ;;  %v2880_v52 = vld [vmem:[#allocation2 + $0x5f8] sm:$0xf0]  ;;  %v2547_v43 = vor.u32 %v3176_v34, %v2544_v35 }
  0x9c   :  { %1587 = vmatpush.bf16.msra.mxu0 %v2323_v61  ;;  %v2259_v61 = vor.u32 %v3104_v46, %v2256_v47  ;;  %v2883_v0 = vor.u32 %v3260_v51, %v2880_v52  ;;  %v2400_v46 = vld [vmem:[#allocation2 + $0x238] sm:$0xf0]  ;;  %v3172_v47 = vld [vmem:[#allocation2 + $0x32c] sm:$0xf]  ;;  %v3469_v52 = vld [vmem:[%s3615_s2] sm:$0xf] }
  0x9d   :  { %1533 = vmatpush.bf16.msra.mxu1 %v2671_v63  ;;  %v2592_v63 = vld [vmem:[#allocation2 + $0x3b8] sm:$0xf0]  ;;  %v3240_v51 = vld [vmem:[#allocation2 + $0x54c] sm:$0xf] }
  0x9e   :  { %1574 = vmatpush.bf16.msrb.mxu2 %v2179_v62  ;;  %v3188_v62 = vld [vmem:[#allocation2 + $0x3ac] sm:$0xf]  ;;  %v2803_v7 = vor.u32 %v3240_v51, %v2800_v57  ;;  %v2768_v22 = vld [vmem:[#allocation2 + $0x518] sm:$0xf0] }
  0x9f   :  { %1547 = vmatpush.bf16.msra.mxu3 %v2799_v3  ;;  %v3256_v3 = vld [vmem:[#allocation2 + $0x5cc] sm:$0xf]  ;;  %v2595_v6 = vor.u32 %v3188_v62, %v2592_v63 }
  0xa0   :  { %1588 = vmatpush.bf16.msra.mxu0 %v2307_v10  ;;  %v2448_v10 = vld [vmem:[#allocation2 + $0x298] sm:$0xf0]  ;;  %v3136_v63 = vld [vmem:[#allocation2 + $0x20c] sm:$0xf] }
  0xa1   :  { %1534 = vmatpush.bf16.msra.mxu1 %v2655_v13  ;;  %v2867_v13 = vor.u32 %v3256_v3, %v2864_v4  ;;  %v2451_v15 = vor.u32 %v3152_v9, %v2448_v10  ;;  %v2512_v3 = vld [vmem:[#allocation2 + $0x318] sm:$0xf0]  ;;  %v3264_v4 = vld [vmem:[#allocation2 + $0x60c] sm:$0xf]  ;;  %v2659_v9 = vor.u32 %v3204_v58, %v2656_v59 }
  0xa2   :  { %1575 = vmatpush.bf16.msrb.mxu2 %v2163_v12  ;;  %v2576_v12 = vld [vmem:[#allocation2 + $0x398] sm:$0xf0] }
  0xa3   :  { %1548 = vmatpush.bf16.msra.mxu3 %v2783_v17  ;;  %v2848_v17 = vld [vmem:[#allocation2 + $0x5b8] sm:$0xf0]  ;;  %v2579_v19 = vor.u32 %v3184_v11, %v2576_v12  ;;  %v3236_v11 = vld [vmem:[#allocation2 + $0x52c] sm:$0xf] }
  0xa4   :  { %1589 = vmatpush.bf16.msra.mxu0 %v2291_v24  ;;  %v2560_v24 = vld [vmem:[#allocation2 + $0x378] sm:$0xf0] }
  0xa5   :  { %1535 = vmatpush.bf16.msra.mxu1 %v2639_v28  ;;  %v2832_v28 = vld [vmem:[#allocation2 + $0x598] sm:$0xf0]  ;;  %v2563_v30 = vor.u32 %v3180_v23, %v2560_v24  ;;  %v3273_v24 = vld [vmem:[%s3616_s3 + $0x30] sm:$0xff] }
  0xa6   :  { %1576 = vmatpush.bf16.msrb.mxu2 %v2147_v27  ;;  %v3248_v27 = vld [vmem:[#allocation2 + $0x58c] sm:$0xf]  ;;  %v2784_v12 = vld [vmem:[#allocation2 + $0x538] sm:$0xf0] }
  0xa7   :  { %1549 = vmatpush.bf16.msra.mxu3 %v2767_v31  ;;  %v2688_v31 = vld [vmem:[#allocation2 + $0x478] sm:$0xf0] }
  0xa8   :  { %1590 = vmatpush.bf16.msra.mxu0 %v2275_v41  ;;  %1536 = vmatmul.bf16.vlgmr.msra.gmra.mxu1 %v3442_v37  ;;  %v3208_v41 = vld [vmem:[#allocation2 + $0x44c] sm:$0xf] }
  0xa9   :  { %1598 = vmatpush.bf16.msrb.mxu1 %v2499_v32  ;;  %v3144_v32 = vld [vmem:[#allocation2 + $0x24c] sm:$0xf]  ;;  %v2675_v53 = vor.u32 %v3208_v41, %v2672_v44  ;;  %v3269_v44 = vld [vmem:[%s3616_s3 + $0x10] sm:$0xff] }
  0xaa   :  { %1550 = vmatmul.bf16.vlgmr.msra.gmra.mxu3 %v3444_v42  ;;  %1577 = vmatpush.bf16.msrb.mxu2 %v2131_v45  ;;  %v2419_v38 = vor.u32 %v3144_v32, %v2416_v33  ;;  %v3140_v45 = vld [vmem:[#allocation2 + $0x22c] sm:$0xf] }
  0xab   :  { %1612 = vmatpush.bf16.msrb.mxu3 %v2627_v36  ;;  %v2691_v36 = vor.u32 %v3212_v29, %v2688_v31  ;;  %v3272_v31 = vld [vmem:[%s3616_s3 + $0x28] sm:$0xff] }
  0xac   :  { %1591 = vmatpush.bf16.msra.mxu0 %v2259_v61  ;;  %v1285_v61 = vpop.f32.mrf.mxu0  ;;  %v3280_v41 = vld [vmem:[%s3616_s3 + $0x68] sm:$0xff] }
  0xad   :  { %1599 = vmatpush.bf16.msrb.mxu1 %v2483_v49  ;;  %1578 = vmatmul.bf16.vlgmr.msrb.gmra.mxu2 %v3404_v55  ;;  %v2851_v55 = vor.u32 %v3252_v16, %v2848_v17  ;;  %v2819_v49 = vor.u32 %v3244_v39, %v2816_v40  ;;  %v2640_v16 = vld [vmem:[#allocation2 + $0x418] sm:$0xf0]  ;;  %v2899_v17 = vor.u32 %v3264_v4, %v2896_v5  ;;  %v250_v4 = vperm.slane %v3469_v52, 1  ;;  %v3275_v5 = vld [vmem:[%s3616_s3 + $0x40] sm:$0xff] }
  0xae   :  { %1626 = vmatpush.bf16.msra.mxu2 %v2755_v48  ;;  %v2528_v48 = vld [vmem:[#allocation2 + $0x338] sm:$0xf0] }
  0xaf   :  { %1613 = vmatpush.bf16.msrb.mxu3 %v2611_v56  ;;  %1592 = vmatmul.bf16.vlgmr.msra.gmra.mxu0 %v3416_v8  ;;  %v2835_v8 = vor.u32 %v3248_v27, %v2832_v28  ;;  %v2403_v56 = vor.u32 %v3140_v45, %v2400_v46  ;;  %v2531_v62 = vor.u32 %v3172_v47, %v2528_v48  ;;  %v1327_v28 = vpop.f32.mrf.mxu3 }
  0xb0   :  { %1640 = vmatpush.bf16.msrb.mxu0 %v2883_v0  ;;  %v2384_v0 = vld [vmem:[#allocation2 + $0x218] sm:$0xf0] }
  0xb1   :  { %1600 = vmatpush.bf16.msrb.mxu1 %v2467_v2  ;;  %v1299_v2 = vpop.f32.mrf.mxu1  ;;  %v2387_v10 = vor.u32 %v3136_v63, %v2384_v0  ;;  %v3277_v0 = vld [vmem:[%s3616_s3 + $0x50] sm:$0xff] }
  0xb2   :  { %1627 = vmatpush.bf16.msra.mxu2 %v2739_v1  ;;  %v3168_v1 = vld [vmem:[#allocation2 + $0x30c] sm:$0xf] }
  0xb3   :  { %1614 = vmatpush.bf16.msrb.mxu3 %v2595_v6  ;;  %v1313_v6 = vpop.f32.mrf.mxu2 }
  0xb4   :  { %1641 = vmatpush.bf16.msrb.mxu0 %v2867_v13  ;;  %v249_v13 = vperm.slane %v3469_v52, 0 }
  0xb5   :  { %1601 = vmatpush.bf16.msrb.mxu1 %v2451_v15  ;;  %v3200_v15 = vld [vmem:[#allocation2 + $0x40c] sm:$0xf] }
  0xb6   :  { %1628 = vmatpush.bf16.msra.mxu2 %v2723_v14  ;;  %v2515_v14 = vor.u32 %v3168_v1, %v2512_v3  ;;  %v2643_v20 = vor.u32 %v3200_v15, %v2640_v16  ;;  %v1286_v23 = vadd.f32 %v1285_v61, %v249_v13  ;;  %v3267_v61 = vld [vmem:[%s3616_s3] sm:$0xff]  ;;  %v3276_v3 = vld [vmem:[%s3616_s3 + $0x48] sm:$0xff] }
  0xb7   :  { %1615 = vmatpush.bf16.msrb.mxu3 %v2579_v19  ;;  %v2787_v19 = vor.u32 %v3236_v11, %v2784_v12  ;;  %v1329_v39 = vpop.f32.mrf.mxu3 }
  0xb8   :  { %1642 = vmatpush.bf16.msrb.mxu0 %v2851_v55  ;;  %v1287_v55 = vpop.f32.mrf.mxu0  ;;  %v1300_v27 = vadd.f32 %v1299_v2, %v1286_v23 }
  0xb9   :  { %1602 = vmatpush.bf16.msrb.mxu1 %v2435_v26  ;;  %v1301_v26 = vpop.f32.mrf.mxu1 }
  0xba   :  { %1629 = vmatpush.bf16.msra.mxu2 %v2707_v25  ;;  %v2771_v25 = vor.u32 %v3232_v21, %v2768_v22  ;;  %v1314_v32 = vadd.f32 %v1313_v6, %v1300_v27 }
  0xbb   :  { %1616 = vmatpush.bf16.msrb.mxu3 %v2563_v30  ;;  %v1315_v29 = vpop.f32.mrf.mxu2  ;;  %v1288_v30 = vadd.f32 %v1287_v55, %v249_v13 }
  0xbc   :  { %1643 = vmatpush.bf16.msrb.mxu0 %v2835_v8  ;;  %v1328_v8 = vadd.f32 %v1327_v28, %v1314_v32  ;;  %v3289_v28 = vld [vmem:[%s3616_s3 + $0xb0] sm:$0xff] }
  0xbd   :  { %1603 = vmatpush.bf16.msrb.mxu1 %v2419_v38  ;;  %v1302_v33 = vadd.f32 %v1301_v26, %v1288_v30 }
  0xbe   :  { %1630 = vmatpush.bf16.msra.mxu2 %v2691_v36 }
  0xbf   :  { %1617 = vmatpush.bf16.msrb.mxu3 %v2547_v43  ;;  %v1316_v38 = vadd.f32 %v1315_v29, %v1302_v33  ;;  %v3288_v33 = vld [vmem:[%s3616_s3 + $0xa8] sm:$0xff] }
  0xc0   :  { %1644 = vmatpush.bf16.msrb.mxu0 %v2819_v49  ;;  %v3279_v49 = vld [vmem:[%s3616_s3 + $0x60] sm:$0xff] }
  0xc1   :  { %1604 = vmatpush.bf16.msrb.mxu1 %v2403_v56  ;;  %v1330_v43 = vadd.f32 %v1329_v39, %v1316_v38  ;;  %v3284_v39 = vld [vmem:[%s3616_s3 + $0x88] sm:$0xff] }
  0xc2   :  { %1631 = vmatpush.bf16.msra.mxu2 %v2675_v53  ;;  %v3268_v53 = vld [vmem:[%s3616_s3 + $0x8] sm:$0xff] }
  0xc3   :  { %1618 = vmatpush.bf16.msrb.mxu3 %v2531_v62  ;;  %v1369_v36 = vpop.f32.mrf.mxu2 }
  0xc4   :  { %1645 = vmatpush.bf16.msrb.mxu0 %v2803_v7  ;;  %v1341_v34 = vpop.f32.mrf.mxu0 }
  0xc5   :  { %1605 = vmatpush.bf16.msrb.mxu1 %v2387_v10  ;;  %v1355_v35 = vpop.f32.mrf.mxu1  ;;  %v1342_v40 = vadd.f32 %v1341_v34, %v1328_v8  ;;  %v3286_v8 = vld [vmem:[%s3616_s3 + $0x98] sm:$0xff] }
  0xc6   :  { %1632 = vmatpush.bf16.msra.mxu2 %v2659_v9 }
  0xc7   :  { %1619 = vmatpush.bf16.msrb.mxu3 %v2515_v14  ;;  %v1356_v45 = vadd.f32 %v1355_v35, %v1342_v40  ;;  %v3287_v35 = vld [vmem:[%s3616_s3 + $0xa0] sm:$0xff] }
  0xc8   :  { %1646 = vmatpush.bf16.msrb.mxu0 %v2787_v19  ;;  %1606 = vmatmul.bf16.vlgmr.msrb.gmra.mxu1 %v3402_v54  ;;  %v3282_v54 = vld [vmem:[%s3616_s3 + $0x78] sm:$0xff]  ;;  %v3283_v40 = vld [vmem:[%s3616_s3 + $0x80] sm:$0xff] }
  0xc9   :  { %1661 = vmatpush.bf16.msra.mxu1 %v2899_v17  ;;  %v1370_v56 = vadd.f32 %v1369_v36, %v1356_v45  ;;  %v3285_v36 = vld [vmem:[%s3616_s3 + $0x90] sm:$0xff] }
  0xca   :  { %1620 = vmatmul.bf16.vlgmr.msrb.gmra.mxu3 %v3406_v60  ;;  %1633 = vmatpush.bf16.msra.mxu2 %v2643_v20  ;;  %v3271_v60 = vld [vmem:[%s3616_s3 + $0x20] sm:$0xff] }
  0xcb   :  { %1940 = vmatpush.bf16.msra.mxu3 %v3274_v18  ;;  %v1371_v57 = vpop.f32.mrf.mxu2  ;;  %v1668_v62 = vmax.f32 %v1370_v56, 0.0 }
  0xcc   :  { %1647 = vmatpush.bf16.msrb.mxu0 %v2771_v25  ;;  %v1343_v46 = vpop.f32.mrf.mxu0  ;;  %v3290_v25 = vld [vmem:[%s3616_s3 + $0xb8] sm:$0xff] }
  0xcd   :  { %1634 = vmatmul.bf16.vlgmr.msra.gmra.mxu2 %v3442_v37  ;;  %1954 = vmatpush.bf16.msrb.mxu1 %v3282_v54  ;;  %v3281_v37 = vld [vmem:[%s3616_s3 + $0x70] sm:$0xff]  ;;  %v1344_v47 = vadd.f32 %v1343_v46, %v1330_v43  ;;  %v1357_v48 = vpop.f32.mrf.mxu1  ;;  %v1383_v63 = vpop.f32.mrf.mxu3  ;;  %v251_v43 = vperm.slane %v3469_v52, 2 }
  0xce   :  { %v1384_v7 = vadd.f32 %v1383_v63, %v250_v4  ;;  %1968 = vmatpush.bf16.msrb.mxu2 %v3290_v25 }
  0xcf   :  { %1941 = vmatpush.bf16.msra.mxu3 %v3273_v24  ;;  %1648 = vmatmul.bf16.vlgmr.msrb.gmra.mxu0 %v3444_v42  ;;  %v3270_v42 = vld [vmem:[%s3616_s3 + $0x18] sm:$0xff]  ;;  %v1358_v51 = vadd.f32 %v1357_v48, %v1344_v47  ;;  %v3297_v48 = vld [vmem:[%s3616_s3 + $0xf0] sm:$0xff] }
  0xd0   :  { %v3298_v47 = vld [vmem:[%s3616_s3 + $0xf8] sm:$0xff] }
  0xd1   :  { %1955 = vmatpush.bf16.msrb.mxu1 %v3281_v37  ;;  %v1372_v58 = vadd.f32 %v1371_v57, %v1358_v51  ;;  %1982 = vmatpush.bf16.msra.mxu0 %v3298_v47 }
  0xd2   :  { %1969 = vmatpush.bf16.msrb.mxu2 %v3289_v28 }
  0xd3   :  { %1942 = vmatpush.bf16.msra.mxu3 %v3272_v31  ;;  %v1672_v59 = vmax.f32 %v1372_v58, 0.0  ;;  %v1397_v2 = vpop.f32.mrf.mxu2 }
  0xd4   :  { %v1398_v11 = vadd.f32 %v1397_v2, %v1384_v7 }
  0xd5   :  { %1956 = vmatpush.bf16.msrb.mxu1 %v3280_v41  ;;  %v1676_v1 = vpack.c.bf16 %v1672_v59, %v1668_v62  ;;  %v1385_v6 = vpop.f32.mrf.mxu3  ;;  %1983 = vmatpush.bf16.msra.mxu0 %v3297_v48  ;;  %v3306_v48 = vld [vmem:[%s3618_s5 + $0x38] sm:$0xff] }
  0xd6   :  { %v1386_v12 = vadd.f32 %v1385_v6, %v250_v4  ;;  %1970 = vmatpush.bf16.msrb.mxu2 %v3288_v33 }
  0xd7   :  { %1943 = vmatpush.bf16.msra.mxu3 %v3271_v60 }
  0xd8   :  { %2903 = vmatmul.msk.bf16.vlgmr.msra.gmra.mxu1 %vm1272_vm0, %v3426_v50  ;;  %v3278_v50 = vld [vmem:[%s3616_s3 + $0x58] sm:$0xff] }
  0xd9   :  { %1957 = vmatpush.bf16.msrb.mxu1 %v3279_v49 }
  0xda   :  { %1971 = vmatpush.bf16.msrb.mxu2 %v3287_v35 }
  0xdb   :  { %1944 = vmatpush.bf16.msra.mxu3 %v3270_v42  ;;  %v1399_v10 = vpop.f32.mrf.mxu2 }
  0xdc   :  { %v1400_v15 = vadd.f32 %v1399_v10, %v1386_v12 }
  0xdd   :  { %1958 = vmatpush.bf16.msrb.mxu1 %v3278_v50 }
  0xde   :  { %1972 = vmatpush.bf16.msrb.mxu2 %v3286_v8 }
  0xdf   :  { %1945 = vmatpush.bf16.msra.mxu3 %v3269_v44 }
  0xe1   :  { %1959 = vmatpush.bf16.msrb.mxu1 %v3277_v0 }
  0xe2   :  { %1973 = vmatpush.bf16.msrb.mxu2 %v3285_v36 }
  0xe3   :  { %1946 = vmatpush.bf16.msra.mxu3 %v3268_v53 }
  0xe4   :  { %v1411_v9 = vpop.f32.mrf.mxu0 }
  0xe5   :  { %1960 = vmatpush.bf16.msrb.mxu1 %v3276_v3  ;;  %v1425_v13 = vpop.f32.mrf.mxu1  ;;  %v1412_v14 = vadd.f32 %v1411_v9, %v1398_v11  ;;  %v3294_v9 = vld [vmem:[%s3616_s3 + $0xd8] sm:$0xff] }
  0xe6   :  { %1974 = vmatpush.bf16.msrb.mxu2 %v3284_v39 }
  0xe7   :  { %1947 = vmatpush.bf16.msra.mxu3 %v3267_v61  ;;  %v1426_v19 = vadd.f32 %v1425_v13, %v1412_v14  ;;  %v3296_v61 = vld [vmem:[%s3616_s3 + $0xe8] sm:$0xff]  ;;  %v3293_v14 = vld [vmem:[%s3616_s3 + $0xd0] sm:$0xff] }
  0xe8   :  { %1984 = vmatpush.bf16.msra.mxu0 %v3296_v61 }
  0xe9   :  { %1961 = vmatpush.bf16.msrb.mxu1 %v3275_v5 }
  0xea   :  { %1948 = vmatmul.bf16.vlgmr.msra.gmra.mxu3 %v1676_v1  ;;  %1975 = vmatpush.bf16.msrb.mxu2 %v3283_v40  ;;  %v3295_v1 = vld [vmem:[%s3616_s3 + $0xe0] sm:$0xff] }
  0xeb   :  { %2067 = vmatpush.bf16.msrb.mxu3 %v3306_v48 }
  0xec   :  { %v1413_v17 = vpop.f32.mrf.mxu0  ;;  %1985 = vmatpush.bf16.msra.mxu0 %v3295_v1 }
  0xed   :  { %v1439_v16 = vpop.f32.mrf.mxu3  ;;  %v1414_v20 = vadd.f32 %v1413_v17, %v1400_v15  ;;  %v1427_v21 = vpop.f32.mrf.mxu1 }
  0xee   :  { %v1440_v22 = vadd.f32 %v1439_v16, %v1426_v19 }
  0xef   :  { %v1428_v23 = vadd.f32 %v1427_v21, %v1414_v20 }
  0xf0   :  { %v1453_v18 = vpop.f32.mrf.mxu2  ;;  %1986 = vmatpush.bf16.msra.mxu0 %v3294_v9 }
  0xf1   :  { %v1454_v26 = vadd.f32 %v1453_v18, %v1440_v22  ;;  %v3292_v18 = vld [vmem:[%s3616_s3 + $0xc8] sm:$0xff]  ;;  %v3291_v22 = vld [vmem:[%s3616_s3 + $0xc0] sm:$0xff] }
  0xf4   :  { %v1467_v55 = vpop.f32.mrf.mxu0  ;;  %1987 = vmatpush.bf16.msra.mxu0 %v3293_v14 }
  0xf5   :  { %v1441_v24 = vpop.f32.mrf.mxu3  ;;  %v1468_v30 = vadd.f32 %v1467_v55, %v1454_v26 }
  0xf6   :  { %v1442_v27 = vadd.f32 %v1441_v24, %v1428_v23  ;;  %v252_v23 = vperm.slane %v3469_v52, 3 }
  0xf7   :  { %v1669_v60 = vmax.f32 %v1468_v30, 0.0 }
  0xf8   :  { %v1455_v29 = vpop.f32.mrf.mxu2  ;;  %1988 = vmatpush.bf16.msra.mxu0 %v3292_v18 }
  0xf9   :  { %v1456_v31 = vadd.f32 %v1455_v29, %v1442_v27 }
  0xfc   :  { %v1469_v54 = vpop.f32.mrf.mxu0  ;;  %1989 = vmatpush.bf16.msra.mxu0 %v3291_v22 }
  0xfd   :  { %v1470_v32 = vadd.f32 %v1469_v54, %v1456_v31 }
  0xff   :  { %v1673_v34 = vmax.f32 %v1470_v32, 0.0 }
 0x101   :  { %v1677_v37 = vpack.c.bf16 %v1673_v34, %v1669_v60 }
 0x103   :  { %1962 = vmatmul.bf16.vlgmr.msrb.gmra.mxu1 %v1677_v37 }
 0x105   :  { %v1481_v38 = vpop.f32.mrf.mxu1 }
 0x106   :  { %v1482_v46 = vadd.f32 %v1481_v38, %v251_v43 }
 0x108   :  { %v1509_v42 = vpop.f32.mrf.mxu0 }
 0x10d   :  { %v1495_v41 = vpop.f32.mrf.mxu3  ;;  %v1483_v44 = vpop.f32.mrf.mxu1 }
 0x10e   :  { %v1496_v53 = vadd.f32 %v1495_v41, %v1482_v46  ;;  %v1484_v56 = vadd.f32 %v1483_v44, %v251_v43 }
 0x110   :  { %v1511_v45 = vpop.f32.mrf.mxu0  ;;  %v1523_v49 = vpop.f32.mrf.mxu2  ;;  %v1510_v50 = vadd.f32 %v1509_v42, %v1496_v53  ;;  %v3303_v53 = vld [vmem:[%s3618_s5 + $0x20] sm:$0xff] }
 0x112   :  { %v1524_v63 = vadd.f32 %v1523_v49, %v1510_v50  ;;  %v3305_v49 = vld [vmem:[%s3618_s5 + $0x30] sm:$0xff]  ;;  %v3299_v50 = vld [vmem:[%s3618_s5] sm:$0xff] }
 0x113   :  { %2068 = vmatpush.bf16.msrb.mxu3 %v3305_v49 }
 0x115   :  { %v1497_v51 = vpop.f32.mrf.mxu3 }
 0x116   :  { %v1498_v59 = vadd.f32 %v1497_v51, %v1484_v56  ;;  %v3304_v51 = vld [vmem:[%s3618_s5 + $0x28] sm:$0xff]  ;;  %v3302_v56 = vld [vmem:[%s3618_s5 + $0x18] sm:$0xff] }
 0x117   :  { %2069 = vmatpush.bf16.msrb.mxu3 %v3304_v51 }
 0x118   :  { %v1565_v58 = vpop.f32.mrf.mxu0  ;;  %v1512_v0 = vadd.f32 %v1511_v45, %v1498_v59  ;;  %v1525_v2 = vpop.f32.mrf.mxu2 }
 0x11a   :  { %v1526_v6 = vadd.f32 %v1525_v2, %v1512_v0 }
 0x11b   :  { %2070 = vmatpush.bf16.msrb.mxu3 %v3303_v53 }
 0x11f   :  { %2071 = vmatpush.bf16.msrb.mxu3 %v3302_v56 }
 0x120   :  { %v1567_v5 = vpop.f32.mrf.mxu0 }
 0x125   :  { %v1537_v57 = vpop.f32.mrf.mxu1 }
 0x126   :  { %v1538_v3 = vadd.f32 %v1537_v57, %v1524_v63  ;;  %v3301_v57 = vld [vmem:[%s3618_s5 + $0x10] sm:$0xff]  ;;  %v3310_v63 = vld [vmem:[%s3617_s4] ss:$0 sm:$0xff] }
 0x127   :  { %2072 = vmatpush.bf16.msrb.mxu3 %v3301_v57 }
 0x12c   :  { %v1593_v20 = vpop.f32.mrf.mxu0 }
 0x12d   :  { %v1551_v62 = vpop.f32.mrf.mxu3  ;;  %v1539_v4 = vpop.f32.mrf.mxu1 }
 0x12e   :  { %v1552_v7 = vadd.f32 %v1551_v62, %v1538_v3  ;;  %v1540_v10 = vadd.f32 %v1539_v4, %v1526_v6 }
 0x130   :  { %v1566_v12 = vadd.f32 %v1565_v58, %v1552_v7  ;;  %v1579_v19 = vpop.f32.mrf.mxu2  ;;  %v3300_v58 = vld [vmem:[%s3618_s5 + $0x8] sm:$0xff] }
 0x131   :  { %v1580_v26 = vadd.f32 %v1579_v19, %v252_v23  ;;  %2073 = vmatpush.bf16.msrb.mxu3 %v3300_v58 }
 0x132   :  { %v1670_v16 = vmax.f32 %v1566_v12, 0.0 }
 0x133   :  { %v1594_v27 = vadd.f32 %v1593_v20, %v1580_v26 }
 0x134   :  { %v1595_v25 = vpop.f32.mrf.mxu0 }
 0x135   :  { %v1553_v11 = vpop.f32.mrf.mxu3  ;;  %2074 = vmatpush.bf16.msrb.mxu3 %v3299_v50 }
 0x136   :  { %v1554_v13 = vadd.f32 %v1553_v11, %v1540_v10 }
 0x138   :  { %v1568_v15 = vadd.f32 %v1567_v5, %v1554_v13  ;;  %v1581_v55 = vpop.f32.mrf.mxu2 }
 0x139   :  { %v1582_v29 = vadd.f32 %v1581_v55, %v252_v23 }
 0x13a   :  { %v1674_v17 = vmax.f32 %v1568_v15, 0.0 }
 0x13b   :  { %v1596_v32 = vadd.f32 %v1595_v25, %v1582_v29 }
 0x13c   :  { %v1678_v21 = vpack.c.bf16 %v1674_v17, %v1670_v16  ;;  %v3311_v17 = vld [vmem:[%s3619_s6] ss:$0 sm:$0xff] }
 0x13e   :  { %1976 = vmatmul.bf16.vlgmr.msrb.gmra.mxu2 %v1678_v21 }
 0x145   :  { %v1607_v24 = vpop.f32.mrf.mxu1 }
 0x146   :  { %v1608_v54 = vadd.f32 %v1607_v24, %v1594_v27 }
 0x14c   :  { %v1649_v33 = vpop.f32.mrf.mxu0 }
 0x14d   :  { %v1621_v28 = vpop.f32.mrf.mxu3  ;;  %v1609_v30 = vpop.f32.mrf.mxu1 }
 0x14e   :  { %v1622_v60 = vadd.f32 %v1621_v28, %v1608_v54  ;;  %v1610_v34 = vadd.f32 %v1609_v30, %v1596_v32 }
 0x150   :  { %v1635_v31 = vpop.f32.mrf.mxu2 }
 0x151   :  { %v1636_v36 = vadd.f32 %v1635_v31, %v1622_v60 }
 0x153   :  { %v1650_v42 = vadd.f32 %v1649_v33, %v1636_v36 }
 0x154   :  { %v1651_v39 = vpop.f32.mrf.mxu0 }
 0x155   :  { %v1623_v35 = vpop.f32.mrf.mxu3  ;;  %v1663_v8 = vpop.f32.mrf.mxu1 }
 0x156   :  { %v1624_v37 = vadd.f32 %v1623_v35, %v1610_v34  ;;  %v1664_v40 = vadd.f32 %v1663_v8, %v1650_v42 }
 0x158   :  { %v1637_v38 = vpop.f32.mrf.mxu2  ;;  %v1671_v45 = vmax.f32 %v1664_v40, 0.0 }
 0x159   :  { %v1638_v52 = vadd.f32 %v1637_v38, %v1624_v37 }
 0x15b   :  { %v1652_v41 = vadd.f32 %v1651_v39, %v1638_v52 }
 0x15d   :  { %v1665_v43 = vpop.f32.mrf.mxu1 }
 0x15e   :  { %v1666_v44 = vadd.f32 %v1665_v43, %v1652_v41 }
 0x160   :  { %v1675_v46 = vmax.f32 %v1666_v44, 0.0 }
 0x162   :  { %v1679_v47 = vpack.c.bf16 %v1675_v46, %v1671_v45 }
 0x164   :  { %1990 = vmatmul.bf16.vlgmr.msra.gmra.mxu0 %v1679_v47 }
 0x16d   :  { %v1949_v59 = vpop.f32.mrf.mxu3 }
 0x16e   :  { %v1950_v2 = vadd.f32 %v3310_v63, %v1949_v59 }
 0x175   :  { %v1951_v0 = vpop.f32.mrf.mxu3 }
 0x176   :  { %v1952_v4 = vadd.f32 %v3310_v63, %v1951_v0 }
 0x180   :  { %v1963_v61 = vpop.f32.mrf.mxu1 }
 0x181   :  { %v1964_v5 = vadd.f32 %v1963_v61, %v1950_v2 }
 0x188   :  { %v1965_v3 = vpop.f32.mrf.mxu1 }
 0x189   :  { %v1966_v7 = vadd.f32 %v1965_v3, %v1952_v4 }
 0x1c1   :  { %v1977_v62 = vpop.f32.mrf.mxu2 }
 0x1c2   :  { %v1978_v9 = vadd.f32 %v1977_v62, %v1964_v5 }
 0x1c9   :  { %v1979_v6 = vpop.f32.mrf.mxu2 }
 0x1ca   :  { %v1980_v10 = vadd.f32 %v1979_v6, %v1966_v7 }
 0x1e1   :  { %v1991_v1 = vpop.f32.mrf.mxu0 }
 0x1e2   :  { %v1992_v11 = vadd.f32 %v1991_v1, %v1978_v9 }
 0x1e4   :  { %v1996_v14 = vmax.f32 %v1992_v11, 0.0 }
 0x1e9   :  { %v1993_v12 = vpop.f32.mrf.mxu0 }
 0x1ea   :  { %v1994_v13 = vadd.f32 %v1993_v12, %v1980_v10 }
 0x1ec   :  { %v1997_v15 = vmax.f32 %v1994_v13, 0.0 }
 0x1ee   :  { %v1998_v16 = vpack.c.bf16 %v1997_v15, %v1996_v14 }
 0x1f0   :  { %2075 = vmatmul.bf16.vlgmr.msrb.gmra.mxu3 %v1998_v16 }
 0x273   :  { %v2076_v18 = vpop.f32.mrf.mxu3 }
 0x274   :  { %v2077_v19 = vadd.f32 %v3311_v17, %v2076_v18 }
 0x276   :  { %2081 = vst [vmem:[%s3620_s7] sm:$0xff] %v2077_v19 }
 0x27b   :  { %v2078_v20 = vpop.f32.mrf.mxu3 }
 0x27c   :  { %v2079_v21 = vadd.f32 %v3311_v17, %v2078_v20 }
 0x27e   :  { %2082 = vst [vmem:[%s3620_s7 + $0x8] sm:$0xff] %v2079_v21 }
 0x27f   :  { %2087 = vsyncpa [#allocation3], 1 }

</bundles_post_ra>
